<compile_context>
chip_gen: v5e
topology: v5e:2x2
jax: 0.10.0
libtpu: 0.0.40
codegen_flags: <defaults>
</compile_context>

<pallas_src>
import math

import jax
import jax.numpy as jnp
from jax.experimental import pallas as pl
from jax.experimental.pallas import tpu as pltpu  # noqa: F401  (TPU backend)

# ----------------------------------------------------------------------------
# Small, module-consistent hyperparameters.
# ----------------------------------------------------------------------------
B       = 2      # batch
IN_CH   = 64     # Conv1d in_channels  (channel axis the conv mixes)
OUT_CH  = 64     # Conv1d out_channels
D_IN    = 32     # LayerNorm / Linear input dim
D_OUT   = 128    # Linear output dim (lane-dense: full 128 lanes, unmasked vst)
LN_EPS  = 1e-5   # nn.LayerNorm default eps


# ----------------------------------------------------------------------------
# In-kernel math helpers (traced inside the Pallas kernel).
# ----------------------------------------------------------------------------
def _erf(x):
    # Abramowitz & Stegun 7.1.26 polynomial (|err| < 1.5e-7).  The divide is
    # done with the EUP approximate reciprocal + one Newton-Raphson step.
    a1, a2, a3, a4, a5 = (0.254829592, -0.284496736, 1.421413741,
                          -1.453152027, 1.061405429)
    p = 0.3275911
    ax = jnp.abs(x)
    d = 1.0 + p * ax
    t = pl.reciprocal(d, approx=True)
    t = t * (2.0 - d * t)                      # Newton step -> ~f32 accuracy
    poly = ((((a5 * t + a4) * t + a3) * t + a2) * t + a1) * t
    y = 1.0 - poly * jnp.exp(-ax * ax)
    return jnp.where(x >= 0, y, -y)


def _gelu(x):
    # F.gelu default ("exact" / erf form).
    return 0.5 * x * (1.0 + _erf(x * 0.7071067811865476))


# ----------------------------------------------------------------------------
# Fused Pallas kernel: the whole (B*IN_CH, D_IN) slab in one invocation.
# ----------------------------------------------------------------------------
def com_unit_kernel(x_ref, g_ref, beta_ref, w1_ref, b1_ref, wsp_ref, bsp_ref,
                    o_ref):
    x = x_ref[...]                                         # (B*IN_CH, D_IN)

    # LayerNorm(d_in) -- one-pass form: two independent reductions.
    mu  = jnp.mean(x, axis=-1, keepdims=True)
    ex2 = jnp.mean(x * x, axis=-1, keepdims=True)
    var = ex2 - mu * mu
    xn = (x - mu) * jax.lax.rsqrt(var + LN_EPS) * g_ref[...] + beta_ref[...]

    # channel_proj1 (Linear d_in -> d_out) + GELU:
    #   one (B*IN_CH, D_IN) x (D_IN, D_OUT) = (128,32)x(32,128) MXU pass.
    y = _gelu(jnp.dot(xn, w1_ref[...],
                      preferred_element_type=jnp.float32) + b1_ref[...])

    # spatial_proj: Conv1d(in_ch, out_ch, 1) for ALL batches at once via a
    # block-diagonal (B*OUT_CH, B*IN_CH) = (128,128) weight -> single MXU dot.
    z = _gelu(jnp.dot(wsp_ref[...], y,
                      preferred_element_type=jnp.float32) + bsp_ref[...])

    o_ref[...] = z                                         # (B*OUT_CH, D_OUT)


def com_unit_forward(x, params):
    g, beta, w1, b1, wsp, bsp = params
    Bx, C, Din = x.shape

    # Collapse the batch axis into the row (sublane) axis: one contiguous DMA,
    # one kernel invocation, 128-row MXU tiles.
    x2 = x.reshape(Bx * C, Din)

    # Conv1d(k=1) over all batches as one matmul: block_diag(wsp, ..., wsp).
    wsp_bd = jnp.kron(jnp.eye(Bx, dtype=wsp.dtype), wsp)   # (Bx*OUT_CH, Bx*IN_CH)
    bsp_bd = jnp.broadcast_to(jnp.tile(bsp, (Bx, 1)),
                              (Bx * OUT_CH, D_OUT))        # lane-dense bias

    out2 = pl.pallas_call(
        com_unit_kernel,
        out_shape=jax.ShapeDtypeStruct((Bx * OUT_CH, D_OUT), jnp.float32),
    )(x2, g, beta, w1, b1, wsp_bd, bsp_bd)

    return out2.reshape(Bx, OUT_CH, D_OUT)


# ----------------------------------------------------------------------------
# Deterministic parameter init (PyTorch-default-style uniform).
# ----------------------------------------------------------------------------
def _uniform(key, shape, bound):
    return jax.random.uniform(key, shape, jnp.float32, -bound, bound)


def init_params(key):
    k1, k2, k3, k4 = jax.random.split(key, 4)
    b_lin = 1.0 / math.sqrt(D_IN)
    b_cnv = 1.0 / math.sqrt(IN_CH)           # Conv1d fan_in = in_ch * k = in_ch
    g    = jnp.ones((1, D_IN), jnp.float32)               # LayerNorm gamma
    beta = jnp.zeros((1, D_IN), jnp.float32)               # LayerNorm beta
    w1   = _uniform(k1, (D_IN, D_OUT), b_lin)              # Linear weight^T
    b1   = _uniform(k2, (1, D_OUT), b_lin)                 # Linear bias
    wsp  = _uniform(k3, (OUT_CH, IN_CH), b_cnv)            # Conv1d weight[:,:,0]
    bsp  = _uniform(k4, (OUT_CH, 1), b_cnv)                # Conv1d bias
    return (g, beta, w1, b1, wsp, bsp)


# ----------------------------------------------------------------------------
# Pure-JAX reference (mirrors the PyTorch forward exactly, original layout).
# ----------------------------------------------------------------------------
def reference_forward(x, params):
    g, beta, w1, b1, wsp, bsp = params
    mu = x.mean(-1, keepdims=True)
    var = ((x - mu) ** 2).mean(-1, keepdims=True)
    xn = (x - mu) / jnp.sqrt(var + LN_EPS) * g + beta
    y = jax.nn.gelu(xn @ w1 + b1, approximate=False)
    z = jnp.einsum("oc,bcd->bod", wsp, y) + bsp[None, :, :]
    return jax.nn.gelu(z, approximate=False)


if __name__ == "__main__":
    key = jax.random.PRNGKey(0)
    pkey, xkey = jax.random.split(key)
    params = init_params(pkey)

    x = jax.random.normal(xkey, (B, IN_CH, D_IN), jnp.float32)

    out = com_unit_forward(x, params)
    out = jax.block_until_ready(out)

    assert out.shape == (B, OUT_CH, D_OUT), out.shape
    assert bool(jnp.all(jnp.isfinite(out)))

    ref = reference_forward(x, params)
    max_err = float(jnp.max(jnp.abs(out - ref)))
    assert max_err < 2e-3, f"mismatch vs reference: {max_err}"

    print("KERNEL_OK")
</pallas_src>

<mosaic_0001>
module attributes {stable_mosaic.version = 11 : i64} {
  func.func @com_unit_kernel(%arg0: memref<128x32xf32, #tpu.memory_space<vmem>>, %arg1: memref<1x32xf32, #tpu.memory_space<vmem>>, %arg2: memref<1x32xf32, #tpu.memory_space<vmem>>, %arg3: memref<32x128xf32, #tpu.memory_space<vmem>>, %arg4: memref<1x128xf32, #tpu.memory_space<vmem>>, %arg5: memref<128x128xf32, #tpu.memory_space<vmem>>, %arg6: memref<128x128xf32, #tpu.memory_space<vmem>>, %arg7: memref<128x128xf32, #tpu.memory_space<vmem>>) attributes {dimension_semantics = [], scalar_prefetch = 0 : i64, scratch_operands = 0 : i64, tpu.core_type = #tpu.core_type<tc>} {
    %c0 = arith.constant 0 : index
    %c0_0 = arith.constant 0 : index
    %0 = vector.load %arg0[%c0, %c0_0] : memref<128x32xf32, #tpu.memory_space<vmem>>, vector<128x32xf32>
    %cst = arith.constant dense<0.000000e+00> : vector<128xf32>
    %1 = vector.multi_reduction <add>, %0, %cst [1] : vector<128x32xf32> to vector<128xf32>
    %2 = vector.shape_cast %1 : vector<128xf32> to vector<128x1xf32>
    %cst_1 = arith.constant 3.200000e+01 : f32
    %3 = vector.broadcast %cst_1 : f32 to vector<128x1xf32>
    %4 = arith.divf %2, %3 : vector<128x1xf32>
    %5 = arith.mulf %0, %0 : vector<128x32xf32>
    %cst_2 = arith.constant dense<0.000000e+00> : vector<128xf32>
    %6 = vector.multi_reduction <add>, %5, %cst_2 [1] : vector<128x32xf32> to vector<128xf32>
    %7 = vector.shape_cast %6 : vector<128xf32> to vector<128x1xf32>
    %cst_3 = arith.constant 3.200000e+01 : f32
    %8 = vector.broadcast %cst_3 : f32 to vector<128x1xf32>
    %9 = arith.divf %7, %8 : vector<128x1xf32>
    %10 = arith.mulf %4, %4 : vector<128x1xf32>
    %11 = arith.subf %9, %10 : vector<128x1xf32>
    %12 = vector.broadcast %4 : vector<128x1xf32> to vector<128x32xf32>
    %13 = arith.subf %0, %12 : vector<128x32xf32>
    %cst_4 = arith.constant 9.99999974E-6 : f32
    %14 = vector.broadcast %cst_4 : f32 to vector<128x1xf32>
    %15 = arith.addf %11, %14 : vector<128x1xf32>
    %16 = math.rsqrt %15 : vector<128x1xf32>
    %17 = vector.broadcast %16 : vector<128x1xf32> to vector<128x32xf32>
    %18 = arith.mulf %13, %17 : vector<128x32xf32>
    %c0_5 = arith.constant 0 : index
    %c0_6 = arith.constant 0 : index
    %19 = vector.load %arg1[%c0_5, %c0_6] : memref<1x32xf32, #tpu.memory_space<vmem>>, vector<1x32xf32>
    %20 = vector.broadcast %19 : vector<1x32xf32> to vector<128x32xf32>
    %21 = arith.mulf %18, %20 : vector<128x32xf32>
    %c0_7 = arith.constant 0 : index
    %c0_8 = arith.constant 0 : index
    %22 = vector.load %arg2[%c0_7, %c0_8] : memref<1x32xf32, #tpu.memory_space<vmem>>, vector<1x32xf32>
    %23 = vector.broadcast %22 : vector<1x32xf32> to vector<128x32xf32>
    %24 = arith.addf %21, %23 : vector<128x32xf32>
    %c0_9 = arith.constant 0 : index
    %c0_10 = arith.constant 0 : index
    %25 = vector.load %arg3[%c0_9, %c0_10] : memref<32x128xf32, #tpu.memory_space<vmem>>, vector<32x128xf32>
    %cst_11 = arith.constant dense<0.000000e+00> : vector<128x128xf32>
    %26 = tpu.matmul %24, %25, %cst_11 {dimension_numbers = #tpu.dot_dimension_numbers<[1], [0], [0], [1], [0, 0, 1, 1], [], []>} : vector<128x32xf32>, vector<32x128xf32>, vector<128x128xf32> -> vector<128x128xf32>
    %c0_12 = arith.constant 0 : index
    %c0_13 = arith.constant 0 : index
    %27 = vector.load %arg4[%c0_12, %c0_13] : memref<1x128xf32, #tpu.memory_space<vmem>>, vector<1x128xf32>
    %28 = vector.broadcast %27 : vector<1x128xf32> to vector<128x128xf32>
    %29 = arith.addf %26, %28 : vector<128x128xf32>
    %cst_14 = arith.constant 5.000000e-01 : f32
    %30 = vector.broadcast %cst_14 : f32 to vector<128x128xf32>
    %31 = arith.mulf %30, %29 : vector<128x128xf32>
    %cst_15 = arith.constant 0.707106769 : f32
    %32 = vector.broadcast %cst_15 : f32 to vector<128x128xf32>
    %33 = arith.mulf %29, %32 : vector<128x128xf32>
    %34 = math.absf %33 : vector<128x128xf32>
    %cst_16 = arith.constant 0.327591091 : f32
    %35 = vector.broadcast %cst_16 : f32 to vector<128x128xf32>
    %36 = arith.mulf %35, %34 : vector<128x128xf32>
    %cst_17 = arith.constant 1.000000e+00 : f32
    %37 = vector.broadcast %cst_17 : f32 to vector<128x128xf32>
    %38 = arith.addf %37, %36 : vector<128x128xf32>
    %39 = tpu.reciprocal %38 {approx = true} : vector<128x128xf32> -> vector<128x128xf32>
    %40 = arith.mulf %38, %39 : vector<128x128xf32>
    %cst_18 = arith.constant 2.000000e+00 : f32
    %41 = vector.broadcast %cst_18 : f32 to vector<128x128xf32>
    %42 = arith.subf %41, %40 : vector<128x128xf32>
    %43 = arith.mulf %39, %42 : vector<128x128xf32>
    %cst_19 = arith.constant 1.06140542 : f32
    %44 = vector.broadcast %cst_19 : f32 to vector<128x128xf32>
    %45 = arith.mulf %44, %43 : vector<128x128xf32>
    %cst_20 = arith.constant -1.45315206 : f32
    %46 = vector.broadcast %cst_20 : f32 to vector<128x128xf32>
    %47 = arith.addf %45, %46 : vector<128x128xf32>
    %48 = arith.mulf %47, %43 : vector<128x128xf32>
    %cst_21 = arith.constant 1.42141378 : f32
    %49 = vector.broadcast %cst_21 : f32 to vector<128x128xf32>
    %50 = arith.addf %48, %49 : vector<128x128xf32>
    %51 = arith.mulf %50, %43 : vector<128x128xf32>
    %cst_22 = arith.constant -0.284496725 : f32
    %52 = vector.broadcast %cst_22 : f32 to vector<128x128xf32>
    %53 = arith.addf %51, %52 : vector<128x128xf32>
    %54 = arith.mulf %53, %43 : vector<128x128xf32>
    %cst_23 = arith.constant 0.254829586 : f32
    %55 = vector.broadcast %cst_23 : f32 to vector<128x128xf32>
    %56 = arith.addf %54, %55 : vector<128x128xf32>
    %57 = arith.mulf %56, %43 : vector<128x128xf32>
    %cst_24 = arith.constant 0.000000e+00 : f32
    %58 = vector.broadcast %cst_24 : f32 to vector<128x128xf32>
    %59 = arith.subf %58, %34 : vector<128x128xf32>
    %60 = arith.mulf %59, %34 : vector<128x128xf32>
    %61 = math.exp %60 : vector<128x128xf32>
    %62 = arith.mulf %57, %61 : vector<128x128xf32>
    %cst_25 = arith.constant 1.000000e+00 : f32
    %63 = vector.broadcast %cst_25 : f32 to vector<128x128xf32>
    %64 = arith.subf %63, %62 : vector<128x128xf32>
    %cst_26 = arith.constant 0.000000e+00 : f32
    %65 = vector.broadcast %cst_26 : f32 to vector<128x128xf32>
    %66 = arith.cmpf oge, %33, %65 : vector<128x128xf32>
    %cst_27 = arith.constant 0.000000e+00 : f32
    %67 = vector.broadcast %cst_27 : f32 to vector<128x128xf32>
    %68 = arith.subf %67, %64 : vector<128x128xf32>
    %69 = arith.select %66, %64, %68 : vector<128x128xi1>, vector<128x128xf32>
    %cst_28 = arith.constant 1.000000e+00 : f32
    %70 = vector.broadcast %cst_28 : f32 to vector<128x128xf32>
    %71 = arith.addf %70, %69 : vector<128x128xf32>
    %72 = arith.mulf %31, %71 : vector<128x128xf32>
    %c0_29 = arith.constant 0 : index
    %c0_30 = arith.constant 0 : index
    %73 = vector.load %arg5[%c0_29, %c0_30] : memref<128x128xf32, #tpu.memory_space<vmem>>, vector<128x128xf32>
    %cst_31 = arith.constant dense<0.000000e+00> : vector<128x128xf32>
    %74 = tpu.matmul %73, %72, %cst_31 {dimension_numbers = #tpu.dot_dimension_numbers<[1], [0], [0], [1], [0, 0, 1, 1], [], []>} : vector<128x128xf32>, vector<128x128xf32>, vector<128x128xf32> -> vector<128x128xf32>
    %c0_32 = arith.constant 0 : index
    %c0_33 = arith.constant 0 : index
    %75 = vector.load %arg6[%c0_32, %c0_33] : memref<128x128xf32, #tpu.memory_space<vmem>>, vector<128x128xf32>
    %76 = arith.addf %74, %75 : vector<128x128xf32>
    %cst_34 = arith.constant 5.000000e-01 : f32
    %77 = vector.broadcast %cst_34 : f32 to vector<128x128xf32>
    %78 = arith.mulf %77, %76 : vector<128x128xf32>
    %cst_35 = arith.constant 0.707106769 : f32
    %79 = vector.broadcast %cst_35 : f32 to vector<128x128xf32>
    %80 = arith.mulf %76, %79 : vector<128x128xf32>
    %81 = math.absf %80 : vector<128x128xf32>
    %cst_36 = arith.constant 0.327591091 : f32
    %82 = vector.broadcast %cst_36 : f32 to vector<128x128xf32>
    %83 = arith.mulf %82, %81 : vector<128x128xf32>
    %cst_37 = arith.constant 1.000000e+00 : f32
    %84 = vector.broadcast %cst_37 : f32 to vector<128x128xf32>
    %85 = arith.addf %84, %83 : vector<128x128xf32>
    %86 = tpu.reciprocal %85 {approx = true} : vector<128x128xf32> -> vector<128x128xf32>
    %87 = arith.mulf %85, %86 : vector<128x128xf32>
    %cst_38 = arith.constant 2.000000e+00 : f32
    %88 = vector.broadcast %cst_38 : f32 to vector<128x128xf32>
    %89 = arith.subf %88, %87 : vector<128x128xf32>
    %90 = arith.mulf %86, %89 : vector<128x128xf32>
    %cst_39 = arith.constant 1.06140542 : f32
    %91 = vector.broadcast %cst_39 : f32 to vector<128x128xf32>
    %92 = arith.mulf %91, %90 : vector<128x128xf32>
    %cst_40 = arith.constant -1.45315206 : f32
    %93 = vector.broadcast %cst_40 : f32 to vector<128x128xf32>
    %94 = arith.addf %92, %93 : vector<128x128xf32>
    %95 = arith.mulf %94, %90 : vector<128x128xf32>
    %cst_41 = arith.constant 1.42141378 : f32
    %96 = vector.broadcast %cst_41 : f32 to vector<128x128xf32>
    %97 = arith.addf %95, %96 : vector<128x128xf32>
    %98 = arith.mulf %97, %90 : vector<128x128xf32>
    %cst_42 = arith.constant -0.284496725 : f32
    %99 = vector.broadcast %cst_42 : f32 to vector<128x128xf32>
    %100 = arith.addf %98, %99 : vector<128x128xf32>
    %101 = arith.mulf %100, %90 : vector<128x128xf32>
    %cst_43 = arith.constant 0.254829586 : f32
    %102 = vector.broadcast %cst_43 : f32 to vector<128x128xf32>
    %103 = arith.addf %101, %102 : vector<128x128xf32>
    %104 = arith.mulf %103, %90 : vector<128x128xf32>
    %cst_44 = arith.constant 0.000000e+00 : f32
    %105 = vector.broadcast %cst_44 : f32 to vector<128x128xf32>
    %106 = arith.subf %105, %81 : vector<128x128xf32>
    %107 = arith.mulf %106, %81 : vector<128x128xf32>
    %108 = math.exp %107 : vector<128x128xf32>
    %109 = arith.mulf %104, %108 : vector<128x128xf32>
    %cst_45 = arith.constant 1.000000e+00 : f32
    %110 = vector.broadcast %cst_45 : f32 to vector<128x128xf32>
    %111 = arith.subf %110, %109 : vector<128x128xf32>
    %cst_46 = arith.constant 0.000000e+00 : f32
    %112 = vector.broadcast %cst_46 : f32 to vector<128x128xf32>
    %113 = arith.cmpf oge, %80, %112 : vector<128x128xf32>
    %cst_47 = arith.constant 0.000000e+00 : f32
    %114 = vector.broadcast %cst_47 : f32 to vector<128x128xf32>
    %115 = arith.subf %114, %111 : vector<128x128xf32>
    %116 = arith.select %113, %111, %115 : vector<128x128xi1>, vector<128x128xf32>
    %cst_48 = arith.constant 1.000000e+00 : f32
    %117 = vector.broadcast %cst_48 : f32 to vector<128x128xf32>
    %118 = arith.addf %117, %116 : vector<128x128xf32>
    %119 = arith.mulf %78, %118 : vector<128x128xf32>
    %c0_49 = arith.constant 0 : index
    %c0_50 = arith.constant 0 : index
    %120 = vector.load %arg7[%c0_49, %c0_50] : memref<128x128xf32, #tpu.memory_space<vmem>>, vector<128x128xf32>
    tpu.vector_store %arg7[%c0_49, %c0_50], %119 {strides = array<i32>} : memref<128x128xf32, #tpu.memory_space<vmem>>, vector<128x128xf32>,
    return
  }
}

</mosaic_0001>

<bundles_post_ra>
// kernel: tpu_custom_call.1
= control target key start
LH: loop header
LB: loop body
LE: loop exit
PB: predicated region body
PF: predicated region fallthrough
CT: control target
= control target key end

     0   :  { %12 = vsyncpa [#allocation3], 0  ;;  %s3245_s0 = inlined_call_operand.vmem [shape: f32[128,32], index: 0, kind: input, shape index: {}]   ;;  %s3246_s1 = inlined_call_operand.vmem [shape: f32[1,32], index: 1, kind: input, shape index: {}]   ;;  %s3247_s2 = inlined_call_operand.vmem [shape: f32[1,32], index: 2, kind: input, shape index: {}]   ;;  %s3248_s3 = inlined_call_operand.vmem [shape: f32[32,128], index: 3, kind: input, shape index: {}]   ;;  %s3249_s4 = inlined_call_operand.vmem [shape: f32[1,128], index: 4, kind: input, shape index: {}]   ;;  %s3250_s5 = inlined_call_operand.vmem [shape: f32[128,128], index: 5, kind: input, shape index: {}]   ;;  %s3251_s6 = inlined_call_operand.hbm [shape: f32[128,128], index: 6, kind: input, shape index: {}]   ;;  %s3252_s7 = inlined_call_operand.hbm [shape: f32[128,128], index: 7, kind: output, shape index: {}]  }
   0x1   :  { %13 = vsyncpa [#allocation4], 0  ;;  %s30_s26 = sshll.u32 %s3251_s6, 4  ;;  %s1946_s27 = smov [#allocation2]   ;;  %s31_s26 = int_to_ptr.hbm [resolvable:$true] %s30_s26 }
   0x2   :  { %s32_s28 = sshll.u32 %s1946_s27, 4  ;;  %s1947_s29 = smov 128   ;;  %s33_s28 = int_to_ptr.vmem [resolvable:$true] %s32_s28 }
   0x3   :  { %s1948_s30 = smov 8  }
   0x4   :  { %38 = dma.hbm_to_vmem [thread:$0]  %s31_s26, 2048, %s33_s28, [#allocation3], %s1947_s29, %s1947_s29, %s1948_s30  }
   0x5   :  { %1942 = dma.done.wait [#allocation3], 2048  }
   0x6   :  { %1943 = vsyncadd [#allocation3], 4294965248  ;;  %vm59_vm0 = vcmask 261120   ;;  %v2000_v0 = vld [vmem:[%s3245_s0 + $0x8] sm:$0xff]  ;;  %v2005_v1 = vld [vmem:[%s3245_s0] sm:$0xff]  ;;  %s1659_s12 = sshll.u32 %s3252_s7, 4  ;;  %s1660_s12 = int_to_ptr.hbm [resolvable:$true] %s1659_s12 }
   0x7   :  { %v2010_v2 = vld [vmem:[%s3245_s0 + $0x50] sm:$0xff]  ;;  %v63_v3 = vsel %vm59_vm0, %v2000_v0, 0.0  ;;  %v60_v4 = vsel %vm59_vm0, %v2005_v1, 0.0  ;;  %v132_v6 = vmul.f32 %v2000_v0, %v2000_v0  ;;  %v131_v7 = vmul.f32 %v2005_v1, %v2005_v1  ;;  %v2038_v14 = vld [vmem:[%s3245_s0 + $0x58] sm:$0xff]  ;;  %v2060_v24 = vld [vmem:[%s3245_s0 + $0x60] sm:$0xff] }
   0x8   :  { %v90_v5 = vsel %vm59_vm0, %v2010_v2, 0.0  ;;  %64 = vadd.xlane.f32.xlu1 %v63_v3  ;;  %61 = vadd.xlane.f32.xlu0 %v60_v4  ;;  %v2025_v8 = vld [vmem:[%s3245_s0 + $0x10] sm:$0xff]  ;;  %v141_v13 = vmul.f32 %v2010_v2, %v2010_v2  ;;  %v93_v17 = vsel %vm59_vm0, %v2038_v14, 0.0  ;;  %v2047_v18 = vld [vmem:[%s3245_s0 + $0x18] sm:$0xff]  ;;  %v142_v19 = vmul.f32 %v2038_v14, %v2038_v14  ;;  %v2065_v25 = vld [vmem:[%s3245_s0 + $0x20] sm:$0xff] }
   0x9   :  { %91 = vadd.xlane.f32.xlu2 %v90_v5  ;;  %v150_v9 = vsel %vm59_vm0, %v132_v6, 0.0  ;;  %v147_v10 = vsel %vm59_vm0, %v131_v7, 0.0  ;;  %v66_v11 = vsel %vm59_vm0, %v2025_v8, 0.0  ;;  %v133_v12 = vmul.f32 %v2025_v8, %v2025_v8  ;;  %v2079_v31 = vld [vmem:[%s3245_s0 + $0x68] sm:$0xff]  ;;  %v2098_v38 = vld [vmem:[%s3245_s0 + $0x70] sm:$0xff]  ;;  %v2120_v48 = vld [vmem:[%s3245_s0 + $0x78] sm:$0xff] }
   0xa   :  { %v177_v16 = vsel %vm59_vm0, %v141_v13, 0.0  ;;  %v134_v20 = vmul.f32 %v2047_v18, %v2047_v18  ;;  %v180_v21 = vsel %vm59_vm0, %v142_v19, 0.0  ;;  %v69_v22 = vsel %vm59_vm0, %v2047_v18, 0.0  ;;  %v2084_v32 = vld [vmem:[%s3245_s0 + $0x28] sm:$0xff]  ;;  %v2107_v42 = vld [vmem:[%s3245_s0 + $0x30] sm:$0xff]  ;;  %v2125_v49 = vld [vmem:[%s3245_s0 + $0x38] sm:$0xff] }
   0xb   :  { %v153_v15 = vsel %vm59_vm0, %v133_v12, 0.0  ;;  %v143_v26 = vmul.f32 %v2060_v24, %v2060_v24  ;;  %v72_v27 = vsel %vm59_vm0, %v2065_v25, 0.0  ;;  %v96_v28 = vsel %vm59_vm0, %v2060_v24, 0.0  ;;  %v2137_v54 = vld [vmem:[%s3245_s0 + $0x40] sm:$0xff]  ;;  %v2150_v60 = vld [vmem:[%s3245_s0 + $0x48] sm:$0xff]  ;;  %v494_v12 = vld [vmem:[%s3248_s3 + $0x18] sm:$0xff] }
   0xc   :  { %v156_v23 = vsel %vm59_vm0, %v134_v20, 0.0  ;;  %v135_v30 = vmul.f32 %v2065_v25, %v2065_v25  ;;  %v99_v33 = vsel %vm59_vm0, %v2079_v31, 0.0  ;;  %v75_v35 = vsel %vm59_vm0, %v2084_v32, 0.0  ;;  %559 = vmatpush.msra.mxu0 %v494_v12  ;;  %1688 = vmatpush.msra.mxu3 %v494_v12  ;;  %v492_v19 = vld [vmem:[%s3248_s3 + $0x8] sm:$0xff] }
   0xd   :  { %v183_v29 = vsel %vm59_vm0, %v143_v26, 0.0  ;;  %v136_v36 = vmul.f32 %v2084_v32, %v2084_v32  ;;  %v144_v37 = vmul.f32 %v2079_v31, %v2079_v31  ;;  %v102_v41 = vsel %vm59_vm0, %v2098_v38, 0.0 }
   0xe   :  { %v159_v34 = vsel %vm59_vm0, %v135_v30, 0.0  ;;  %v145_v43 = vmul.f32 %v2098_v38, %v2098_v38  ;;  %v137_v44 = vmul.f32 %v2107_v42, %v2107_v42  ;;  %v78_v46 = vsel %vm59_vm0, %v2107_v42, 0.0 }
   0xf   :  { %v162_v39 = vsel %vm59_vm0, %v136_v36, 0.0  ;;  %v186_v40 = vsel %vm59_vm0, %v144_v37, 0.0  ;;  %v146_v50 = vmul.f32 %v2120_v48, %v2120_v48  ;;  %v81_v51 = vsel %vm59_vm0, %v2125_v49, 0.0 }
  0x10   :  { %151 = vadd.xlane.f32.xlu1 %v150_v9  ;;  %148 = vadd.xlane.f32.xlu0 %v147_v10  ;;  %v189_v45 = vsel %vm59_vm0, %v145_v43, 0.0  ;;  %v165_v47 = vsel %vm59_vm0, %v137_v44, 0.0  ;;  %v105_v52 = vsel %vm59_vm0, %v2120_v48, 0.0  ;;  %v138_v55 = vmul.f32 %v2125_v49, %v2125_v49 }
  0x11   :  { %67 = vadd.xlane.f32.xlu2 %v66_v11  ;;  %v192_v53 = vsel %vm59_vm0, %v146_v50, 0.0  ;;  %v139_v56 = vmul.f32 %v2137_v54, %v2137_v54  ;;  %v84_v57 = vsel %vm59_vm0, %v2137_v54, 0.0  ;;  %v140_v61 = vmul.f32 %v2150_v60, %v2150_v60 }
  0x12   :  { %v168_v58 = vsel %vm59_vm0, %v138_v55, 0.0  ;;  %v87_v62 = vsel %vm59_vm0, %v2150_v60, 0.0  ;;  %v1949_v3 = vmov 32.0  }
  0x13   :  { %v171_v59 = vsel %vm59_vm0, %v139_v56, 0.0  ;;  %v174_v63 = vsel %vm59_vm0, %v140_v61, 0.0  ;;  %1732 = vrcp.f32 %v1949_v3 }
  0x18   :  { %154 = vadd.xlane.f32.xlu1 %v153_v15  ;;  %178 = vadd.xlane.f32.xlu0 %v177_v16  ;;  %v493_v16 = vld [vmem:[%s3248_s3 + $0x10] sm:$0xff] }
  0x19   :  { %94 = vadd.xlane.f32.xlu2 %v93_v17  ;;  %v1733_v4 = vpop.eup %1732  ;;  %560 = vmatpush.msra.mxu0 %v493_v16 }
  0x1a   :  { %v109_v5 = vmul.f32 32.0, %v1733_v4  ;;  %vm113_vm1 = vweird.f32 %v1733_v4  ;;  %1689 = vmatpush.msra.mxu3 %v493_v16 }
  0x1b   :  { %561 = vmatpush.msra.mxu0 %v492_v19 }
  0x1c   :  { %v110_v6 = vsub.f32 1.0, %v109_v5  ;;  %1690 = vmatpush.msra.mxu3 %v492_v19 }
  0x1e   :  { %v111_v7 = vmul.f32 %v1733_v4, %v110_v6 }
  0x20   :  { %181 = vadd.xlane.f32.xlu1 %v180_v21  ;;  %70 = vadd.xlane.f32.xlu0 %v69_v22  ;;  %v112_v9 = vadd.f32 %v1733_v4, %v111_v7  ;;  %v491_v21 = vld [vmem:[%s3248_s3] sm:$0xff] }
  0x21   :  { %157 = vadd.xlane.f32.xlu2 %v156_v23  ;;  %562 = vmatpush.msra.mxu0 %v491_v21 }
  0x22   :  { %v2160_v15 = vsel %vm113_vm1, %v1733_v4, %v112_v9  ;;  %1691 = vmatpush.msra.mxu3 %v491_v21 }
  0x28   :  { %73 = vadd.xlane.f32.xlu1 %v72_v27  ;;  %97 = vadd.xlane.f32.xlu0 %v96_v28 }
  0x29   :  { %184 = vadd.xlane.f32.xlu2 %v183_v29 }
  0x30   :  { %100 = vadd.xlane.f32.xlu1 %v99_v33  ;;  %160 = vadd.xlane.f32.xlu0 %v159_v34 }
  0x31   :  { %76 = vadd.xlane.f32.xlu2 %v75_v35 }
  0x38   :  { %163 = vadd.xlane.f32.xlu1 %v162_v39  ;;  %187 = vadd.xlane.f32.xlu0 %v186_v40 }
  0x39   :  { %103 = vadd.xlane.f32.xlu2 %v102_v41 }
  0x40   :  { %190 = vadd.xlane.f32.xlu1 %v189_v45  ;;  %79 = vadd.xlane.f32.xlu0 %v78_v46 }
  0x41   :  { %166 = vadd.xlane.f32.xlu2 %v165_v47 }
  0x48   :  { %82 = vadd.xlane.f32.xlu1 %v81_v51  ;;  %106 = vadd.xlane.f32.xlu0 %v105_v52 }
  0x49   :  { %193 = vadd.xlane.f32.xlu2 %v192_v53 }
  0x50   :  { %85 = vadd.xlane.f32.xlu1 %v84_v57  ;;  %169 = vadd.xlane.f32.xlu0 %v168_v58 }
  0x51   :  { %172 = vadd.xlane.f32.xlu2 %v171_v59 }
  0x58   :  { %88 = vadd.xlane.f32.xlu0 %v87_v62  ;;  %175 = vadd.xlane.f32.xlu1 %v174_v63 }
  0x7b   :  { %v65_v10 = vpop.xlane.xlu1 %64  ;;  %v62_v11 = vpop.xlane.xlu0 %61 }
  0x7c   :  { %v92_v13 = vpop.xlane.xlu2 %91  ;;  %v2166_v17 = vmul.f32 %v2160_v15, %v65_v10  ;;  %v2172_v20 = vmul.f32 %v2160_v15, %v62_v11 }
  0x7d   :  { %v2187_v36 = vmul.f32 %v2160_v15, %v92_v13 }
  0x7e   :  { %v212_v22 = vmul.f32 %v2166_v17, %v2166_v17  ;;  %v211_v27 = vmul.f32 %v2172_v20, %v2172_v20 }
  0x7f   :  { %v221_v44 = vmul.f32 %v2187_v36, %v2187_v36 }
  0x83   :  { %v152_v23 = vpop.xlane.xlu1 %151  ;;  %v149_v26 = vpop.xlane.xlu0 %148 }
  0x84   :  { %v196_v28 = vmul.f32 %v152_v23, %v2160_v15  ;;  %v195_v29 = vmul.f32 %v149_v26, %v2160_v15  ;;  %v68_v30 = vpop.xlane.xlu2 %67 }
  0x85   :  { %v2184_v35 = vmul.f32 %v2160_v15, %v68_v30  ;;  %v253_v30 = vsub.f32 %v2010_v2, %v2187_v36 }
  0x86   :  { %v228_v33 = vsub.f32 %v196_v28, %v212_v22  ;;  %v227_v34 = vsub.f32 %v195_v29, %v211_v27 }
  0x87   :  { %v213_v40 = vmul.f32 %v2184_v35, %v2184_v35 }
  0x88   :  { %v2189_v37 = vadd.f32 1e-05, %v228_v33  ;;  %v259_v39 = vadd.f32 1e-05, %v227_v34 }
  0x8a   :  { %1734 = vrsqrt.f32 %v2189_v37  ;;  %vm281_vm3 = vweird.f32 %v259_v39  ;;  %vm291_vm6 = vweird.f32 %v2189_v37 }
  0x8b   :  { %1736 = vrsqrt.f32 %v259_v39  ;;  %v155_v41 = vpop.xlane.xlu1 %154  ;;  %v179_v43 = vpop.xlane.xlu0 %178 }
  0x8c   :  { %v197_v45 = vmul.f32 %v155_v41, %v2160_v15  ;;  %v205_v46 = vmul.f32 %v179_v43, %v2160_v15  ;;  %v95_v47 = vpop.xlane.xlu2 %94 }
  0x8d   :  { %v2199_v52 = vmul.f32 %v2160_v15, %v95_v47  ;;  %v243_v47 = vsub.f32 %v2005_v1, %v2172_v20 }
  0x8e   :  { %v229_v50 = vsub.f32 %v197_v45, %v213_v40  ;;  %v237_v51 = vsub.f32 %v205_v46, %v221_v44 }
  0x8f   :  { %v222_v61 = vmul.f32 %v2199_v52, %v2199_v52 }
  0x90   :  { %v2201_v53 = vpop.eup %1734  ;;  %v2203_v55 = vadd.f32 1e-05, %v229_v50  ;;  %v2205_v56 = vadd.f32 1e-05, %v237_v51 }
  0x91   :  { %v1737_v57 = vpop.eup %1736  ;;  %v286_v58 = vmul.f32 %v2201_v53, %v2189_v37  ;;  %vm292_vm4 = vweird.f32 %v2201_v53 }
  0x92   :  { %v276_v59 = vmul.f32 %v1737_v57, %v259_v39  ;;  %1738 = vrsqrt.f32 %v2203_v55  ;;  %vm282_vm2 = vweird.f32 %v1737_v57  ;;  %vm2261_vm7 = vmor %vm291_vm6, %vm292_vm4  ;;  %vm301_vm9 = vweird.f32 %v2203_v55 }
  0x93   :  { %v287_v62 = vmul.f32 %v2201_v53, %v286_v58  ;;  %1740 = vrsqrt.f32 %v2205_v56  ;;  %v182_v63 = vpop.xlane.xlu1 %181  ;;  %v71_v3 = vpop.xlane.xlu0 %70  ;;  %vm2233_vm5 = vmor %vm281_vm3, %vm282_vm2  ;;  %v2254_v58 = vld [vmem:[%s3246_s1] ss:$0 sm:$0xff]  ;;  %vm381_vm12 = vweird.f32 %v2205_v56 }
  0x94   :  { %v277_v4 = vmul.f32 %v1737_v57, %v276_v59  ;;  %v206_v5 = vmul.f32 %v182_v63, %v2160_v15  ;;  %v2216_v6 = vmul.f32 %v2160_v15, %v71_v3  ;;  %v158_v7 = vpop.xlane.xlu2 %157  ;;  %v2271_v63 = vld [vmem:[%s3247_s2] ss:$0 sm:$0xff]  ;;  %v244_v3 = vsub.f32 %v2000_v0, %v2166_v17 }
  0x95   :  { %v288_v9 = vmul.f32 0.5, %v287_v62  ;;  %v198_v10 = vmul.f32 %v158_v7, %v2160_v15 }
  0x96   :  { %v278_v11 = vmul.f32 0.5, %v277_v4  ;;  %v238_v12 = vsub.f32 %v206_v5, %v222_v61  ;;  %v214_v13 = vmul.f32 %v2216_v6, %v2216_v6 }
  0x97   :  { %v289_v19 = vsub.f32 1.5, %v288_v9 }
  0x98   :  { %v2221_v16 = vpop.eup %1738  ;;  %v279_v21 = vsub.f32 1.5, %v278_v11  ;;  %v2223_v22 = vadd.f32 1e-05, %v238_v12  ;;  %v230_v23 = vsub.f32 %v198_v10, %v214_v13 }
  0x99   :  { %v2225_v26 = vpop.eup %1740  ;;  %v296_v27 = vmul.f32 %v2221_v16, %v2203_v55  ;;  %v290_v43 = vmul.f32 %v2201_v53, %v289_v19  ;;  %vm302_vm8 = vweird.f32 %v2221_v16 }
  0x9a   :  { %v280_v28 = vmul.f32 %v1737_v57, %v279_v21  ;;  %v376_v29 = vmul.f32 %v2225_v26, %v2205_v56  ;;  %1742 = vrsqrt.f32 %v2223_v22  ;;  %v2238_v34 = vadd.f32 1e-05, %v230_v23  ;;  %vm2296_vm11 = vmor %vm301_vm9, %vm302_vm8 }
  0x9b   :  { %v297_v33 = vmul.f32 %v2221_v16, %v296_v27  ;;  %v74_v40 = vpop.xlane.xlu1 %73  ;;  %v98_v41 = vpop.xlane.xlu0 %97  ;;  %v294_v7 = vsel %vm2261_vm7, %v2201_v53, %v290_v43  ;;  %vm382_vm10 = vweird.f32 %v2225_v26  ;;  %vm391_vm14 = vweird.f32 %v2223_v22 }
  0x9c   :  { %v377_v39 = vmul.f32 %v2225_v26, %v376_v29  ;;  %v2243_v44 = vmul.f32 %v2160_v15, %v98_v41  ;;  %v185_v45 = vpop.xlane.xlu2 %184  ;;  %v284_v46 = vsel %vm2233_vm5, %v1737_v57, %v280_v28  ;;  %1744 = vrsqrt.f32 %v2238_v34  ;;  %vm2308_vm13 = vmor %vm381_vm12, %vm382_vm10 }
  0x9d   :  { %v298_v50 = vmul.f32 0.5, %v297_v33  ;;  %v207_v51 = vmul.f32 %v185_v45, %v2160_v15  ;;  %v2266_v57 = vmul.f32 %v2160_v15, %v74_v40  ;;  %v435_v62 = vmul.f32 %v284_v46, %v243_v47 }
  0x9e   :  { %v378_v59 = vmul.f32 0.5, %v377_v39  ;;  %v223_v61 = vmul.f32 %v2243_v44, %v2243_v44  ;;  %v436_v27 = vmul.f32 %v294_v7, %v244_v3  ;;  %v245_v45 = vsub.f32 %v2025_v8, %v2184_v35 }
  0x9f   :  { %v299_v20 = vsub.f32 1.5, %v298_v50  ;;  %v455_v11 = vmul.f32 %v2254_v58, %v435_v62  ;;  %v215_v13 = vmul.f32 %v2266_v57, %v2266_v57  ;;  %vm311_vm3 = vweird.f32 %v2238_v34 }
  0xa0   :  { %v2273_v37 = vpop.eup %1742  ;;  %v379_v4 = vsub.f32 1.5, %v378_v59  ;;  %v239_v5 = vsub.f32 %v207_v51, %v223_v61  ;;  %v456_v50 = vmul.f32 %v2254_v58, %v436_v27 }
  0xa1   :  { %v300_v9 = vmul.f32 %v2221_v16, %v299_v20  ;;  %v386_v10 = vmul.f32 %v2273_v37, %v2223_v22  ;;  %v475_v19 = vadd.f32 %v2271_v63, %v455_v11  ;;  %vm392_vm15 = vweird.f32 %v2273_v37 }
  0xa2   :  { %v380_v12 = vmul.f32 %v2225_v26, %v379_v4  ;;  %v2288_v0 = vadd.f32 1e-05, %v239_v5  ;;  %v2290_v17 = vpop.eup %1744  ;;  %v476_v3 = vadd.f32 %v2271_v63, %v456_v50  ;;  %vm393_vm2 = vmor %vm391_vm14, %vm392_vm15 }
  0xa3   :  { %v387_v53 = vmul.f32 %v2273_v37, %v386_v10  ;;  %v101_v21 = vpop.xlane.xlu1 %100  ;;  %v161_v23 = vpop.xlane.xlu0 %160  ;;  %v306_v28 = vmul.f32 %v2290_v17, %v2238_v34  ;;  %1672 = vmatmul.msk.f32.vlgmr.msra.gmra.mxu0 %vm59_vm0, %v475_v19  ;;  %v304_v41 = vsel %vm2296_vm11, %v2221_v16, %v300_v9  ;;  %v254_v16 = vsub.f32 %v2038_v14, %v2199_v52 }
  0xa4   :  { %1746 = vrsqrt.f32 %v2288_v0  ;;  %v77_v29 = vpop.xlane.xlu2 %76  ;;  %v199_v56 = vmul.f32 %v161_v23, %v2160_v15  ;;  %v2319_v39 = vmul.f32 %v2160_v15, %v101_v21  ;;  %v384_v36 = vsel %vm2308_vm13, %v2225_v26, %v380_v12 }
  0xa5   :  { %v388_v40 = vmul.f32 0.5, %v387_v53  ;;  %v307_v43 = vmul.f32 %v2290_v17, %v306_v28  ;;  %v2322_v2 = vmul.f32 %v2160_v15, %v77_v29  ;;  %v445_v59 = vmul.f32 %v384_v36, %v253_v30 }
  0xa6   :  { %v231_v47 = vsub.f32 %v199_v56, %v215_v13  ;;  %v437_v26 = vmul.f32 %v304_v41, %v245_v45  ;;  %v224_v35 = vmul.f32 %v2319_v39, %v2319_v39  ;;  %vm312_vm1 = vweird.f32 %v2290_v17 }
  0xa7   :  { %v389_v46 = vsub.f32 1.5, %v388_v40  ;;  %v308_v51 = vmul.f32 0.5, %v307_v43  ;;  %v216_v14 = vmul.f32 %v2322_v2, %v2322_v2  ;;  %v465_v52 = vmul.f32 %v2254_v58, %v445_v59  ;;  %vm2366_vm4 = vmor %vm311_vm3, %vm312_vm1 }
  0xa8   :  { %v2335_v1 = vadd.f32 1e-05, %v231_v47  ;;  %v457_v13 = vmul.f32 %v2254_v58, %v437_v26  ;;  %v246_v40 = vsub.f32 %v2047_v18, %v2216_v6  ;;  %vm401_vm5 = vweird.f32 %v2288_v0 }
  0xa9   :  { %v390_v61 = vmul.f32 %v2273_v37, %v389_v46  ;;  %v309_v8 = vsub.f32 1.5, %v308_v51  ;;  %v485_v9 = vadd.f32 %v2271_v63, %v465_v52  ;;  %v255_v51 = vsub.f32 %v2060_v24, %v2243_v44 }
  0xaa   :  { %v2337_v20 = vpop.eup %1746  ;;  %1748 = vrsqrt.f32 %v2335_v1  ;;  %vm321_vm9 = vweird.f32 %v2335_v1 }
  0xab   :  { %v396_v62 = vmul.f32 %v2337_v20, %v2288_v0  ;;  %v164_v4 = vpop.xlane.xlu1 %163  ;;  %v188_v5 = vpop.xlane.xlu0 %187  ;;  %v310_v7 = vmul.f32 %v2290_v17, %v309_v8  ;;  %1673 = vmatmul.msk.f32.gmra.mxu0 %vm59_vm0, %v476_v3  ;;  %v394_v22 = vsel %vm393_vm2, %v2273_v37, %v390_v61  ;;  %1682 = vmatmul.msk.f32.vlgmr.msra.gmra.mxu3 %vm59_vm0, %v485_v9  ;;  %vm402_vm6 = vweird.f32 %v2337_v20 }
  0xac   :  { %v200_v10 = vmul.f32 %v164_v4, %v2160_v15  ;;  %v208_v11 = vmul.f32 %v188_v5, %v2160_v15  ;;  %v104_v12 = vpop.xlane.xlu2 %103  ;;  %v446_v27 = vmul.f32 %v394_v22, %v254_v16  ;;  %vm403_vm7 = vmor %vm401_vm5, %vm402_vm6 }
  0xad   :  { %v397_v53 = vmul.f32 %v2337_v20, %v396_v62  ;;  %v2362_v23 = vmul.f32 %v2160_v15, %v104_v12  ;;  %v314_v30 = vsel %vm2366_vm4, %v2290_v17, %v310_v7  ;;  %v477_v17 = vadd.f32 %v2271_v63, %v457_v13 }
  0xae   :  { %v232_v19 = vsub.f32 %v200_v10, %v216_v14  ;;  %v240_v21 = vsub.f32 %v208_v11, %v224_v35  ;;  %v466_v37 = vmul.f32 %v2254_v58, %v446_v27  ;;  %v438_v45 = vmul.f32 %v314_v30, %v246_v40 }
  0xaf   :  { %v398_v55 = vmul.f32 0.5, %v397_v53  ;;  %v225_v43 = vmul.f32 %v2362_v23, %v2362_v23 }
  0xb0   :  { %v2370_v28 = vadd.f32 1e-05, %v232_v19  ;;  %v2372_v29 = vadd.f32 1e-05, %v240_v21  ;;  %v2378_v33 = vpop.eup %1748  ;;  %v486_v18 = vadd.f32 %v2271_v63, %v466_v37  ;;  %v458_v14 = vmul.f32 %v2254_v58, %v438_v45 }
  0xb1   :  { %v399_v56 = vsub.f32 1.5, %v398_v55  ;;  %v316_v41 = vmul.f32 %v2378_v33, %v2335_v1  ;;  %vm322_vm8 = vweird.f32 %v2378_v33  ;;  %v247_v55 = vsub.f32 %v2065_v25, %v2266_v57 }
  0xb2   :  { %1750 = vrsqrt.f32 %v2370_v28  ;;  %vm2422_vm10 = vmor %vm321_vm9, %vm322_vm8  ;;  %v478_v53 = vadd.f32 %v2271_v63, %v458_v14  ;;  %vm331_vm12 = vweird.f32 %v2370_v28  ;;  %vm411_vm15 = vweird.f32 %v2372_v29 }
  0xb3   :  { %v400_v36 = vmul.f32 %v2337_v20, %v399_v56  ;;  %1752 = vrsqrt.f32 %v2372_v29  ;;  %v191_v6 = vpop.xlane.xlu1 %190  ;;  %v80_v0 = vpop.xlane.xlu0 %79  ;;  %v317_v46 = vmul.f32 %v2378_v33, %v316_v41  ;;  %1674 = vmatmul.msk.f32.gmra.mxu0 %vm59_vm0, %v477_v17  ;;  %1683 = vmatmul.msk.f32.gmra.mxu3 %vm59_vm0, %v486_v18 }
  0xb4   :  { %v209_v47 = vmul.f32 %v191_v6, %v2160_v15  ;;  %v2396_v50 = vmul.f32 %v2160_v15, %v80_v0  ;;  %v167_v16 = vpop.xlane.xlu2 %166 }
  0xb5   :  { %v201_v59 = vmul.f32 %v167_v16, %v2160_v15  ;;  %v404_v61 = vsel %vm403_vm7, %v2337_v20, %v400_v36  ;;  %v318_v26 = vmul.f32 0.5, %v317_v46 }
  0xb6   :  { %v241_v8 = vsub.f32 %v209_v47, %v225_v43  ;;  %v217_v35 = vmul.f32 %v2396_v50, %v2396_v50  ;;  %v447_v52 = vmul.f32 %v404_v61, %v255_v51 }
  0xb7   :  { %v319_v3 = vsub.f32 1.5, %v318_v26 }
  0xb8   :  { %v2407_v62 = vpop.eup %1750  ;;  %v2410_v24 = vadd.f32 1e-05, %v241_v8  ;;  %v233_v44 = vsub.f32 %v201_v59, %v217_v35  ;;  %v467_v5 = vmul.f32 %v2254_v58, %v447_v52  ;;  %v248_v8 = vsub.f32 %v2084_v32, %v2322_v2 }
  0xb9   :  { %v2412_v4 = vpop.eup %1752  ;;  %v326_v20 = vmul.f32 %v2407_v62, %v2370_v28  ;;  %v320_v7 = vmul.f32 %v2378_v33, %v319_v3  ;;  %vm332_vm11 = vweird.f32 %v2407_v62  ;;  %v256_v32 = vsub.f32 %v2079_v31, %v2319_v39 }
  0xba   :  { %v406_v9 = vmul.f32 %v2412_v4, %v2372_v29  ;;  %1754 = vrsqrt.f32 %v2410_v24  ;;  %v2427_v12 = vadd.f32 1e-05, %v233_v44  ;;  %v487_v19 = vadd.f32 %v2271_v63, %v467_v5  ;;  %vm2457_vm13 = vmor %vm331_vm12, %vm332_vm11 }
  0xbb   :  { %v327_v11 = vmul.f32 %v2407_v62, %v326_v20  ;;  %v83_v13 = vpop.xlane.xlu1 %82  ;;  %v107_v22 = vpop.xlane.xlu0 %106  ;;  %v324_v34 = vsel %vm2422_vm10, %v2378_v33, %v320_v7  ;;  %1675 = vmatmul.msk.f32.gmra.mxu0 %vm59_vm0, %v478_v53  ;;  %vm412_vm14 = vweird.f32 %v2412_v4  ;;  %vm421_vm3 = vweird.f32 %v2410_v24 }
  0xbc   :  { %v407_v1 = vmul.f32 %v2412_v4, %v406_v9  ;;  %v2433_v21 = vmul.f32 %v2160_v15, %v107_v22  ;;  %v194_v27 = vpop.xlane.xlu2 %193  ;;  %1756 = vrsqrt.f32 %v2427_v12  ;;  %1684 = vmatmul.msk.f32.gmra.mxu3 %vm59_vm0, %v487_v19  ;;  %v2448_v33 = vmul.f32 %v2160_v15, %v83_v13  ;;  %vm413_vm1 = vmor %vm411_vm15, %vm412_vm14 }
  0xbd   :  { %v328_v37 = vmul.f32 0.5, %v327_v11  ;;  %v210_v30 = vmul.f32 %v194_v27, %v2160_v15  ;;  %v439_v25 = vmul.f32 %v324_v34, %v247_v55  ;;  %vm341_vm6 = vweird.f32 %v2427_v12 }
  0xbe   :  { %v408_v40 = vmul.f32 0.5, %v407_v1  ;;  %v226_v56 = vmul.f32 %v2433_v21, %v2433_v21  ;;  %v218_v28 = vmul.f32 %v2448_v33, %v2448_v33 }
  0xbf   :  { %v329_v41 = vsub.f32 1.5, %v328_v37  ;;  %v459_v6 = vmul.f32 %v2254_v58, %v439_v25 }
  0xc0   :  { %v2450_v57 = vpop.eup %1754  ;;  %v409_v43 = vsub.f32 1.5, %v408_v40  ;;  %v242_v17 = vsub.f32 %v210_v30, %v226_v56  ;;  %v2560_v30 = vld [vmem:[%s3249_s4] ss:$0 sm:$0xff] }
  0xc1   :  { %v330_v36 = vmul.f32 %v2407_v62, %v329_v41  ;;  %v416_v18 = vmul.f32 %v2450_v57, %v2410_v24  ;;  %v479_v51 = vadd.f32 %v2271_v63, %v459_v6  ;;  %vm422_vm2 = vweird.f32 %v2450_v57 }
  0xc2   :  { %v410_v45 = vmul.f32 %v2412_v4, %v409_v43  ;;  %v2463_v46 = vadd.f32 1e-05, %v242_v17  ;;  %v2465_v47 = vpop.eup %1756  ;;  %vm2505_vm5 = vmor %vm421_vm3, %vm422_vm2  ;;  %v249_v43 = vsub.f32 %v2107_v42, %v2396_v50 }
  0xc3   :  { %v417_v16 = vmul.f32 %v2450_v57, %v416_v18  ;;  %v86_v59 = vpop.xlane.xlu1 %85  ;;  %v170_v61 = vpop.xlane.xlu0 %169  ;;  %v334_v26 = vsel %vm2457_vm13, %v2407_v62, %v330_v36  ;;  %v336_v35 = vmul.f32 %v2465_v47, %v2427_v12  ;;  %1676 = vmatmul.msk.f32.gmra.mxu0 %vm59_vm0, %v479_v51  ;;  %vm342_vm4 = vweird.f32 %v2465_v47 }
  0xc4   :  { %1758 = vrsqrt.f32 %v2463_v46  ;;  %v173_v14 = vpop.xlane.xlu2 %172  ;;  %v2482_v3 = vmul.f32 %v2160_v15, %v86_v59  ;;  %v202_v62 = vmul.f32 %v170_v61, %v2160_v15  ;;  %v440_v29 = vmul.f32 %v334_v26, %v248_v8  ;;  %vm343_vm7 = vmor %vm341_vm6, %vm342_vm4 }
  0xc5   :  { %v418_v52 = vmul.f32 0.5, %v417_v16  ;;  %v203_v44 = vmul.f32 %v173_v14, %v2160_v15  ;;  %v337_v2 = vmul.f32 %v2465_v47, %v336_v35  ;;  %v414_v20 = vsel %vm413_vm1, %v2412_v4, %v410_v45 }
  0xc6   :  { %v219_v7 = vmul.f32 %v2482_v3, %v2482_v3  ;;  %v234_v9 = vsub.f32 %v202_v62, %v218_v28  ;;  %v460_v11 = vmul.f32 %v2254_v58, %v440_v29  ;;  %v448_v53 = vmul.f32 %v414_v20, %v256_v32 }
  0xc7   :  { %v419_v5 = vsub.f32 1.5, %v418_v52  ;;  %v338_v10 = vmul.f32 0.5, %v337_v2  ;;  %v257_v4 = vsub.f32 %v2098_v38, %v2362_v23  ;;  %vm431_vm9 = vweird.f32 %v2463_v46 }
  0xc8   :  { %v2495_v22 = vadd.f32 1e-05, %v234_v9  ;;  %v235_v31 = vsub.f32 %v203_v44, %v219_v7  ;;  %v480_v1 = vadd.f32 %v2271_v63, %v460_v11  ;;  %v468_v27 = vmul.f32 %v2254_v58, %v448_v53 }
  0xc9   :  { %v420_v13 = vmul.f32 %v2450_v57, %v419_v5  ;;  %v339_v19 = vsub.f32 1.5, %v338_v10 }
  0xca   :  { %v1759_v39 = vpop.eup %1758  ;;  %1760 = vrsqrt.f32 %v2495_v22  ;;  %v267_v23 = vadd.f32 1e-05, %v235_v31  ;;  %v488_v40 = vadd.f32 %v2271_v63, %v468_v27  ;;  %vm351_vm12 = vweird.f32 %v2495_v22 }
  0xcb   :  { %v426_v34 = vmul.f32 %v1759_v39, %v2463_v46  ;;  %v89_v55 = vpop.xlane.xlu0 %88  ;;  %v176_v37 = vpop.xlane.xlu1 %175  ;;  %v340_v38 = vmul.f32 %v2465_v47, %v339_v19  ;;  %1677 = vmatmul.msk.f32.gmra.mxu0 %vm59_vm0, %v480_v1  ;;  %v424_v25 = vsel %vm2505_vm5, %v2450_v57, %v420_v13  ;;  %vm432_vm8 = vweird.f32 %v1759_v39 }
  0xcc   :  { %v2512_v56 = vmul.f32 %v2160_v15, %v89_v55  ;;  %v204_v41 = vmul.f32 %v176_v37, %v2160_v15  ;;  %1762 = vrsqrt.f32 %v267_v23  ;;  %1685 = vmatmul.msk.f32.gmra.mxu3 %vm59_vm0, %v488_v40  ;;  %v449_v36 = vmul.f32 %v424_v25, %v257_v4  ;;  %vm433_vm10 = vmor %vm431_vm9, %vm432_vm8 }
  0xcd   :  { %v427_v24 = vmul.f32 %v1759_v39, %v426_v34  ;;  %v344_v15 = vsel %vm343_vm7, %v2465_v47, %v340_v38  ;;  %v258_v47 = vsub.f32 %v2120_v48, %v2433_v21  ;;  %v250_v21 = vsub.f32 %v2125_v49, %v2448_v33 }
  0xce   :  { %v220_v12 = vmul.f32 %v2512_v56, %v2512_v56  ;;  %v441_v6 = vmul.f32 %v344_v15, %v249_v43  ;;  %v469_v42 = vmul.f32 %v2254_v58, %v449_v36  ;;  %vm361_vm14 = vweird.f32 %v267_v23 }
  0xcf   :  { %v428_v17 = vmul.f32 0.5, %v427_v24  ;;  %v251_v49 = vsub.f32 %v2137_v54, %v2482_v3  ;;  %v252_v54 = vsub.f32 %v2150_v60, %v2512_v56 }
  0xd0   :  { %v236_v18 = vsub.f32 %v204_v41, %v220_v12  ;;  %v1761_v0 = vpop.eup %1760  ;;  %v461_v16 = vmul.f32 %v2254_v58, %v441_v6  ;;  %v489_v51 = vadd.f32 %v2271_v63, %v469_v42 }
  0xd1   :  { %v429_v57 = vsub.f32 1.5, %v428_v17  ;;  %v346_v50 = vmul.f32 %v1761_v0, %v2495_v22  ;;  %vm352_vm11 = vweird.f32 %v1761_v0 }
  0xd2   :  { %v268_v45 = vadd.f32 1e-05, %v236_v18  ;;  %v1763_v59 = vpop.eup %1762  ;;  %v481_v26 = vadd.f32 %v2271_v63, %v461_v16  ;;  %vm353_vm13 = vmor %vm351_vm12, %vm352_vm11 }
  0xd3   :  { %v430_v28 = vmul.f32 %v1759_v39, %v429_v57  ;;  %v347_v61 = vmul.f32 %v1761_v0, %v346_v50  ;;  %v356_v8 = vmul.f32 %v1763_v59, %v267_v23  ;;  %vm362_vm15 = vweird.f32 %v1763_v59 }
  0xd4   :  { %1764 = vrsqrt.f32 %v268_v45  ;;  %1686 = vmatmul.msk.f32.gmra.mxu3 %vm59_vm0, %v489_v51  ;;  %1678 = vmatmul.msk.f32.gmra.mxu0 %vm59_vm0, %v481_v26  ;;  %vm363_vm1 = vmor %vm361_vm14, %vm362_vm15  ;;  %vm371_vm2 = vweird.f32 %v268_v45 }
  0xd5   :  { %v434_v35 = vsel %vm433_vm10, %v1759_v39, %v430_v28  ;;  %v348_v14 = vmul.f32 0.5, %v347_v61  ;;  %v357_v46 = vmul.f32 %v1763_v59, %v356_v8 }
  0xd6   :  { %v450_v52 = vmul.f32 %v434_v35, %v258_v47 }
  0xd7   :  { %v349_v62 = vsub.f32 1.5, %v348_v14  ;;  %v358_v32 = vmul.f32 0.5, %v357_v46 }
  0xd8   :  { %v470_v44 = vmul.f32 %v2254_v58, %v450_v52 }
  0xd9   :  { %v350_v2 = vmul.f32 %v1761_v0, %v349_v62  ;;  %v359_v20 = vsub.f32 1.5, %v358_v32 }
  0xda   :  { %v1765_v48 = vpop.eup %1764  ;;  %v490_v29 = vadd.f32 %v2271_v63, %v470_v44 }
  0xdb   :  { %v366_v5 = vmul.f32 %v1765_v48, %v268_v45  ;;  %v354_v7 = vsel %vm353_vm13, %v1761_v0, %v350_v2  ;;  %v360_v9 = vmul.f32 %v1763_v59, %v359_v20  ;;  %vm372_vm3 = vweird.f32 %v1765_v48 }
  0xdc   :  { %v442_v11 = vmul.f32 %v354_v7, %v250_v21  ;;  %1687 = vmatmul.msk.f32.gmra.mxu3 %vm59_vm0, %v490_v29  ;;  %vm373_vm4 = vmor %vm371_vm2, %vm372_vm3 }
  0xdd   :  { %v367_v10 = vmul.f32 %v1765_v48, %v366_v5  ;;  %v364_v13 = vsel %vm363_vm1, %v1763_v59, %v360_v9 }
  0xde   :  { %v462_v53 = vmul.f32 %v2254_v58, %v442_v11  ;;  %v443_v39 = vmul.f32 %v364_v13, %v251_v49 }
  0xdf   :  { %v368_v33 = vmul.f32 0.5, %v367_v10 }
  0xe0   :  { %v482_v31 = vadd.f32 %v2271_v63, %v462_v53  ;;  %v463_v19 = vmul.f32 %v2254_v58, %v443_v39 }
  0xe1   :  { %v369_v22 = vsub.f32 1.5, %v368_v33 }
  0xe2   :  { %1679 = vmatmul.msk.f32.gmra.mxu0 %vm59_vm0, %v482_v31  ;;  %v483_v3 = vadd.f32 %v2271_v63, %v463_v19 }
  0xe3   :  { %v370_v4 = vmul.f32 %v1765_v48, %v369_v22 }
  0xe5   :  { %v374_v1 = vsel %vm373_vm4, %v1765_v48, %v370_v4 }
  0xe6   :  { %v444_v27 = vmul.f32 %v374_v1, %v252_v54 }
  0xe8   :  { %v464_v34 = vmul.f32 %v2254_v58, %v444_v27 }
  0xea   :  { %1680 = vmatmul.msk.f32.gmra.mxu0 %vm59_vm0, %v483_v3  ;;  %v484_v55 = vadd.f32 %v2271_v63, %v464_v34 }
  0xf2   :  { %1681 = vmatmul.msk.f32.gmra.mxu0 %vm59_vm0, %v484_v55 }
 0x120   :  { %v564_v37 = vpop.f32.mrf.mxu0 }
 0x121   :  { %v2563_v60 = vadd.f32 %v2560_v30, %v564_v37 }
 0x123   :  { %3283 = vst [vmem:[#allocation8_spill] sm:$0xff] %v2563_v60  ;;  %v2569_v40 = vmul.f32 0.70710677, %v2563_v60 }
 0x125   :  { %3285 = vst [vmem:[#allocation10_spill] sm:$0xff] %v2569_v40  ;;  %v644_v41 = vand.u32 2147483647, %v2569_v40 }
 0x127   :  { %v660_v36 = vmul.f32 0.3275911, %v644_v41  ;;  %v900_v52 = vsub.f32 0.0, %v644_v41 }
 0x128   :  { %v567_v38 = vpop.f32.mrf.mxu0 }
 0x129   :  { %v2566_v23 = vadd.f32 %v2560_v30, %v567_v38  ;;  %v676_v45 = vadd.f32 1.0, %v660_v36  ;;  %v916_v9 = vmul.f32 %v900_v52, %v644_v41 }
 0x12b   :  { %3284 = vst [vmem:[#allocation9_spill] sm:$0xff] %v2566_v23  ;;  %v2572_v63 = vmul.f32 0.70710677, %v2566_v23  ;;  %v2622_v19 = vmul.f32 1.442695, %v916_v9 }
 0x12d   :  { %3286 = vst [vmem:[#allocation11_spill] sm:$0xff] %v2572_v63  ;;  %v645_v12 = vand.u32 2147483647, %v2572_v63 }
 0x12e   :  { %v594_v58 = vpop.f32.mrf.mxu3  ;;  %3292 = vst [vmem:[#allocation17_spill] sm:$0xff] %v2622_v19 }
 0x12f   :  { %v2575_v56 = vadd.f32 %v2560_v30, %v594_v58  ;;  %v661_v0 = vmul.f32 0.3275911, %v645_v12  ;;  %v901_v20 = vsub.f32 0.0, %v645_v12 }
 0x130   :  { %v570_v24 = vpop.f32.mrf.mxu0 }
 0x131   :  { %v2579_v25 = vmul.f32 0.70710677, %v2575_v56  ;;  %v2582_v43 = vadd.f32 %v2560_v30, %v570_v24  ;;  %v677_v59 = vadd.f32 1.0, %v661_v0  ;;  %v917_v31 = vmul.f32 %v901_v20, %v645_v12 }
 0x132   :  { %v2632_v36 = vmul.f32 0.5, %v2575_v56 }
 0x133   :  { %3287 = vst [vmem:[#allocation12_spill] sm:$0xff] %v2582_v43  ;;  %v654_v17 = vand.u32 2147483647, %v2579_v25  ;;  %v2587_v18 = vmul.f32 0.70710677, %v2582_v43  ;;  %vm1006_vm7 = vcmp.ge.f32.partialorder %v2579_v25, 0.0 }
 0x135   :  { %v670_v15 = vmul.f32 0.3275911, %v654_v17  ;;  %3288 = vst [vmem:[#allocation13_spill] sm:$0xff] %v2587_v18  ;;  %v646_v28 = vand.u32 2147483647, %v2587_v18  ;;  %v910_v7 = vsub.f32 0.0, %v654_v17 }
 0x136   :  { %v597_v6 = vpop.f32.mrf.mxu3 }
 0x137   :  { %v686_v57 = vadd.f32 1.0, %v670_v15  ;;  %v2590_v42 = vadd.f32 %v2560_v30, %v597_v6  ;;  %v662_v26 = vmul.f32 0.3275911, %v646_v28  ;;  %v902_v49 = vsub.f32 0.0, %v646_v28 }
 0x138   :  { %v573_v50 = vpop.f32.mrf.mxu0  ;;  %v926_v39 = vmul.f32 %v910_v7, %v654_v17  ;;  %v2629_v17 = vmul.f32 1.442695, %v917_v31 }
 0x139   :  { %v2593_v16 = vadd.f32 %v2560_v30, %v573_v50  ;;  %1766 = vrcp.f32 %v686_v57  ;;  %v2597_v51 = vmul.f32 0.70710677, %v2590_v42  ;;  %v678_v2 = vadd.f32 1.0, %v662_v26 }
 0x13a   :  { %1768 = vrcp.f32 %v676_v45  ;;  %v918_v55 = vmul.f32 %v902_v49, %v646_v28  ;;  %3294 = vst [vmem:[#allocation19_spill] sm:$0xff] %v2629_v17  ;;  %v952_v15 = vmul.f32 1.442695, %v926_v39 }
 0x13b   :  { %3289 = vst [vmem:[#allocation14_spill] sm:$0xff] %v2593_v16  ;;  %v2600_v47 = vmul.f32 0.70710677, %v2593_v16  ;;  %v655_v61 = vand.u32 2147483647, %v2597_v51  ;;  %1770 = vrcp.f32 %v677_v59  ;;  %vm1007_vm5 = vcmp.ge.f32.partialorder %v2597_v51, 0.0 }
 0x13d   :  { %3290 = vst [vmem:[#allocation15_spill] sm:$0xff] %v2600_v47  ;;  %v671_v8 = vmul.f32 0.3275911, %v655_v61  ;;  %v2604_v46 = vand.u32 2147483647, %v2600_v47  ;;  %v911_v41 = vsub.f32 0.0, %v655_v61 }
 0x13f   :  { %v600_v35 = vpop.f32.mrf.mxu3  ;;  %v1767_v14 = vpop.eup %1766  ;;  %v687_v32 = vadd.f32 1.0, %v671_v8  ;;  %v663_v10 = vmul.f32 0.3275911, %v2604_v46  ;;  %v903_v26 = vsub.f32 0.0, %v2604_v46  ;;  %v927_v56 = vmul.f32 %v911_v41, %v655_v61 }
 0x140   :  { %v576_v62 = vpop.f32.mrf.mxu0  ;;  %v718_v44 = vmul.f32 %v1767_v14, %v686_v57  ;;  %v2610_v21 = vadd.f32 %v2560_v30, %v600_v35  ;;  %v1769_v29 = vpop.eup %1768 }
 0x141   :  { %v2607_v48 = vadd.f32 %v2560_v30, %v576_v62  ;;  %1772 = vrcp.f32 %v687_v32  ;;  %v1771_v53 = vpop.eup %1770  ;;  %v708_v13 = vmul.f32 %v1769_v29, %v676_v45  ;;  %v679_v1 = vadd.f32 1.0, %v663_v10 }
 0x142   :  { %v734_v5 = vsub.f32 2.0, %v718_v44  ;;  %v2617_v33 = vmul.f32 0.70710677, %v2610_v21  ;;  %1774 = vrcp.f32 %v678_v2  ;;  %v709_v34 = vmul.f32 %v1771_v53, %v677_v59 }
 0x143   :  { %3291 = vst [vmem:[#allocation16_spill] sm:$0xff] %v2607_v48  ;;  %v2614_v11 = vmul.f32 0.70710677, %v2607_v48  ;;  %v724_v58 = vsub.f32 2.0, %v708_v13  ;;  %1776 = vrcp.f32 %v679_v1  ;;  %v936_v59 = vmul.f32 1.442695, %v918_v55 }
 0x144   :  { %v2619_v22 = vmul.f32 %v1767_v14, %v734_v5  ;;  %v656_v4 = vand.u32 2147483647, %v2617_v33  ;;  %v725_v28 = vsub.f32 2.0, %v709_v34  ;;  %v2646_v62 = vmul.f32 0.5, %v2590_v42 }
 0x145   :  { %v648_v54 = vand.u32 2147483647, %v2614_v11  ;;  %v2640_v8 = vmul.f32 %v1769_v29, %v724_v58  ;;  %v919_v61 = vmul.f32 %v903_v26, %v2604_v46  ;;  %v954_v13 = vmul.f32 1.442695, %v927_v56 }
 0x146   :  { %v672_v37 = vmul.f32 0.3275911, %v656_v4  ;;  %v766_v12 = vmul.f32 1.0614054, %v2619_v22  ;;  %v2651_v9 = vmul.f32 %v1771_v53, %v725_v28  ;;  %v912_v10 = vsub.f32 0.0, %v656_v4 }
 0x147   :  { %v1773_v27 = vpop.eup %1772  ;;  %v664_v50 = vmul.f32 0.3275911, %v648_v54  ;;  %3295 = vst [vmem:[#allocation20_spill] sm:$0xff] %v2640_v8  ;;  %v904_v5 = vsub.f32 0.0, %v648_v54  ;;  %v2655_v42 = vmul.f32 0.5, %v2610_v21  ;;  %vm1008_vm0 = vcmp.ge.f32.partialorder %v2617_v33, 0.0 }
 0x148   :  { %v579_v3 = vpop.f32.mrf.mxu0  ;;  %v719_v24 = vmul.f32 %v1773_v27, %v687_v32  ;;  %v688_v6 = vadd.f32 1.0, %v672_v37  ;;  %v2634_v0 = vpop.eup %1774  ;;  %v782_v14 = vadd.f32 -1.4531521, %v766_v12  ;;  %v938_v41 = vmul.f32 1.442695, %v919_v61 }
 0x149   :  { %v2626_v38 = vadd.f32 %v2560_v30, %v579_v3  ;;  %v710_v52 = vmul.f32 %v2634_v0, %v678_v2  ;;  %v680_v20 = vadd.f32 1.0, %v664_v50  ;;  %v1777_v2 = vpop.eup %1776  ;;  %v920_v46 = vmul.f32 %v904_v5, %v648_v54 }
 0x14a   :  { %v735_v57 = vsub.f32 2.0, %v719_v24  ;;  %1778 = vrcp.f32 %v688_v6  ;;  %v798_v39 = vmul.f32 %v782_v14, %v2619_v22  ;;  %v711_v21 = vmul.f32 %v1777_v2, %v679_v1 }
 0x14b   :  { %3293 = vst [vmem:[#allocation18_spill] sm:$0xff] %v2626_v38  ;;  %v2637_v45 = vmul.f32 0.70710677, %v2626_v38  ;;  %1780 = vpow2.f32 %v952_v15  ;;  %v928_v12 = vmul.f32 %v912_v10, %v656_v4  ;;  %vm1000_vm14 = vcmp.ge.f32.partialorder %v2614_v11, 0.0 }
 0x14c   :  { %v2642_v35 = vmul.f32 %v1773_v27, %v735_v57  ;;  %1782 = vpow2.f32 %v936_v59  ;;  %v726_v27 = vsub.f32 2.0, %v710_v52  ;;  %v814_v28 = vadd.f32 1.4214138, %v798_v39 }
 0x14d   :  { %v649_v44 = vand.u32 2147483647, %v2637_v45  ;;  %1784 = vrcp.f32 %v680_v20  ;;  %v940_v52 = vmul.f32 1.442695, %v920_v46  ;;  %v727_v5 = vsub.f32 2.0, %v711_v21 }
 0x14e   :  { %v767_v29 = vmul.f32 1.0614054, %v2642_v35  ;;  %1786 = vpow2.f32 %v954_v13  ;;  %v830_v39 = vmul.f32 %v814_v28, %v2619_v22  ;;  %vm1001_vm13 = vcmp.ge.f32.partialorder %v2637_v45, 0.0 }
 0x14f   :  { %v603_v32 = vpop.f32.mrf.mxu3  ;;  %v665_v34 = vmul.f32 0.3275911, %v649_v44  ;;  %v905_v56 = vsub.f32 0.0, %v649_v44  ;;  %1788 = vpow2.f32 %v938_v41 }
 0x150   :  { %v604_v7 = vadd.f32 %v2560_v30, %v603_v32  ;;  %v1779_v3 = vpop.eup %1778  ;;  %v783_v55 = vadd.f32 -1.4531521, %v767_v29  ;;  %v956_v29 = vmul.f32 1.442695, %v928_v12  ;;  %v2689_v12 = vmul.f32 %v1777_v2, %v727_v5 }
 0x151   :  { %v582_v49 = vpop.f32.mrf.mxu0  ;;  %v720_v37 = vmul.f32 %v1779_v3, %v688_v6  ;;  %v2664_v24 = vpop.eup %1780  ;;  %v681_v26 = vadd.f32 1.0, %v665_v34  ;;  %v921_v34 = vmul.f32 %v905_v56, %v649_v44 }
 0x152   :  { %v2657_v31 = vmul.f32 0.70710677, %v604_v7  ;;  %v2661_v53 = vadd.f32 %v2560_v30, %v582_v49  ;;  %v2669_v59 = vpop.eup %1782  ;;  %v799_v14 = vmul.f32 %v783_v55, %v2642_v35  ;;  %v2691_v28 = vmul.f32 0.5, %v604_v7  ;;  %v3308_v11 = vld [vmem:[#allocation18_spill] sm:$0xff] }
 0x153   :  { %v736_v57 = vsub.f32 2.0, %v720_v37  ;;  %3297 = vst [vmem:[#allocation22_spill] sm:$0xff] %v2669_v59  ;;  %v1785_v10 = vpop.eup %1784  ;;  %v2686_v37 = vmul.f32 %v2634_v0, %v726_v27  ;;  %v942_v23 = vmul.f32 1.442695, %v921_v34 }
 0x154   :  { %3296 = vst [vmem:[#allocation21_spill] sm:$0xff] %v2661_v53  ;;  %v657_v58 = vand.u32 2147483647, %v2657_v31  ;;  %v2667_v15 = vmul.f32 0.70710677, %v2661_v53  ;;  %v2683_v46 = vpop.eup %1786  ;;  %vm1009_vm6 = vcmp.ge.f32.partialorder %v2657_v31, 0.0 }
 0x155   :  { %v2673_v1 = vmul.f32 %v1779_v3, %v736_v57  ;;  %v815_v55 = vadd.f32 1.4214138, %v799_v14  ;;  %v712_v57 = vmul.f32 %v1785_v10, %v680_v20  ;;  %v846_v14 = vadd.f32 -0.28449672, %v830_v39  ;;  %v2693_v60 = vpop.eup %1788 }
 0x156   :  { %v673_v50 = vmul.f32 0.3275911, %v657_v58  ;;  %v650_v54 = vand.u32 2147483647, %v2667_v15  ;;  %v913_v49 = vsub.f32 0.0, %v657_v58  ;;  %3298 = vst [vmem:[#allocation23_spill] sm:$0xff] %v2693_v60 }
 0x157   :  { %v606_v6 = vpop.f32.mrf.mxu3  ;;  %v768_v3 = vmul.f32 1.0614054, %v2673_v1  ;;  %v831_v2 = vmul.f32 %v815_v55, %v2642_v35  ;;  %vm1002_vm11 = vcmp.ge.f32.partialorder %v2667_v15, 0.0 }
 0x158   :  { %v689_v4 = vadd.f32 1.0, %v673_v50  ;;  %v2676_v32 = vadd.f32 %v2560_v30, %v606_v6  ;;  %v666_v61 = vmul.f32 0.3275911, %v650_v54  ;;  %v929_v44 = vmul.f32 %v913_v49, %v657_v58 }
 0x159   :  { %v784_v50 = vadd.f32 -1.4531521, %v768_v3  ;;  %v906_v5 = vsub.f32 0.0, %v650_v54 }
 0x15a   :  { %1790 = vrcp.f32 %v689_v4  ;;  %v2679_v13 = vmul.f32 0.70710677, %v2676_v32  ;;  %v682_v21 = vadd.f32 1.0, %v666_v61  ;;  %v728_v61 = vsub.f32 2.0, %v712_v57 }
 0x15b   :  { %1792 = vrcp.f32 %v681_v26  ;;  %v847_v57 = vadd.f32 -0.28449672, %v831_v2  ;;  %v922_v43 = vmul.f32 %v906_v5, %v650_v54  ;;  %v862_v2 = vmul.f32 %v846_v14, %v2619_v22  ;;  %v3306_v45 = vld [vmem:[#allocation21_spill] sm:$0xff] }
 0x15c   :  { %1794 = vpow2.f32 %v940_v52  ;;  %v658_v41 = vand.u32 2147483647, %v2679_v13  ;;  %v800_v52 = vmul.f32 %v784_v50, %v2673_v1  ;;  %v2715_v18 = vmul.f32 %v1785_v10, %v728_v61 }
 0x15d   :  { %1796 = vpow2.f32 %v956_v29  ;;  %v863_v10 = vmul.f32 %v847_v57, %v2642_v35  ;;  %v944_v5 = vmul.f32 1.442695, %v922_v43  ;;  %vm1010_vm8 = vcmp.ge.f32.partialorder %v2679_v13, 0.0 }
 0x15e   :  { %v674_v56 = vmul.f32 0.3275911, %v658_v41  ;;  %1798 = vrcp.f32 %v682_v21  ;;  %v816_v34 = vadd.f32 1.4214138, %v800_v52  ;;  %v914_v50 = vsub.f32 0.0, %v658_v41 }
 0x15f   :  { %v585_v6 = vpop.f32.mrf.mxu0  ;;  %v609_v27 = vpop.f32.mrf.mxu3 }
 0x160   :  { %v2696_v0 = vadd.f32 %v2560_v30, %v585_v6  ;;  %v1791_v20 = vpop.eup %1790  ;;  %v690_v7 = vadd.f32 1.0, %v674_v56  ;;  %v610_v58 = vadd.f32 %v2560_v30, %v609_v27  ;;  %v958_v6 = vmul.f32 1.442695, %v929_v44 }
 0x161   :  { %v1793_v29 = vpop.eup %1792  ;;  %v721_v49 = vmul.f32 %v1791_v20, %v689_v4  ;;  %v832_v27 = vmul.f32 %v816_v34, %v2673_v1 }
 0x162   :  { %3299 = vst [vmem:[#allocation24_spill] sm:$0xff] %v2696_v0  ;;  %v2702_v39 = vmul.f32 0.70710677, %v2696_v0  ;;  %v2704_v3 = vpop.eup %1794  ;;  %1800 = vrcp.f32 %v690_v7  ;;  %v2706_v40 = vmul.f32 0.70710677, %v610_v58  ;;  %v713_v4 = vmul.f32 %v1793_v29, %v681_v26 }
 0x163   :  { %v2708_v55 = vpop.eup %1796  ;;  %v737_v63 = vsub.f32 2.0, %v721_v49  ;;  %1802 = vpow2.f32 %v942_v23  ;;  %v848_v48 = vadd.f32 -0.28449672, %v832_v27  ;;  %v930_v49 = vmul.f32 %v914_v50, %v658_v41 }
 0x164   :  { %v651_v56 = vand.u32 2147483647, %v2702_v39  ;;  %v2713_v52 = vand.u32 2147483647, %v2706_v40  ;;  %v1799_v59 = vpop.eup %1798  ;;  %1804 = vpow2.f32 %v958_v6  ;;  %v2728_v6 = vmul.f32 0.5, %v2676_v32 }
 0x165   :  { %v2717_v44 = vmul.f32 %v1791_v20, %v737_v63  ;;  %v729_v20 = vsub.f32 2.0, %v713_v4  ;;  %v864_v34 = vmul.f32 %v848_v48, %v2673_v1  ;;  %v714_v41 = vmul.f32 %v1799_v59, %v682_v21 }
 0x166   :  { %v667_v16 = vmul.f32 0.3275911, %v651_v56  ;;  %v675_v19 = vmul.f32 0.3275911, %v2713_v52  ;;  %v907_v4 = vsub.f32 0.0, %v651_v56  ;;  %v2743_v53 = vmul.f32 0.5, %v610_v58 }
 0x167   :  { %v588_v38 = vpop.f32.mrf.mxu0  ;;  %v769_v54 = vmul.f32 1.0614054, %v2717_v44  ;;  %v880_v43 = vadd.f32 0.2548296, %v864_v34  ;;  %v2737_v48 = vmul.f32 %v1793_v29, %v729_v20  ;;  %v915_v34 = vsub.f32 0.0, %v2713_v52 }
 0x168   :  { %v683_v26 = vadd.f32 1.0, %v667_v16  ;;  %v2722_v23 = vadd.f32 %v2560_v30, %v588_v38  ;;  %v1801_v63 = vpop.eup %1800  ;;  %v691_v61 = vadd.f32 1.0, %v675_v19  ;;  %v960_v38 = vmul.f32 1.442695, %v930_v49 }
 0x169   :  { %v722_v50 = vmul.f32 %v1801_v63, %v690_v7  ;;  %v2730_v16 = vpop.eup %1802  ;;  %v785_v27 = vadd.f32 -1.4531521, %v769_v54  ;;  %v879_v19 = vadd.f32 0.2548296, %v863_v10  ;;  %v730_v7 = vsub.f32 2.0, %v714_v41 }
 0x16a   :  { %1806 = vrcp.f32 %v683_v26  ;;  %v2733_v14 = vmul.f32 0.70710677, %v2722_v23  ;;  %v2735_v17 = vpop.eup %1804  ;;  %v896_v54 = vmul.f32 %v880_v43, %v2673_v1  ;;  %v923_v20 = vmul.f32 %v907_v4, %v651_v56 }
 0x16b   :  { %1808 = vrcp.f32 %v691_v61  ;;  %v738_v57 = vsub.f32 2.0, %v722_v50  ;;  %v801_v21 = vmul.f32 %v785_v27, %v2717_v44  ;;  %v2754_v43 = vmul.f32 %v1799_v59, %v730_v7 }
 0x16c   :  { %1810 = vpow2.f32 %v944_v5  ;;  %v652_v32 = vand.u32 2147483647, %v2733_v14  ;;  %v931_v7 = vmul.f32 %v915_v34, %v2713_v52  ;;  %vm1011_vm9 = vcmp.ge.f32.partialorder %v2706_v40, 0.0 }
 0x16d   :  { %v2741_v49 = vmul.f32 %v1801_v63, %v738_v57  ;;  %1812 = vpow2.f32 %v960_v38  ;;  %v817_v47 = vadd.f32 1.4214138, %v801_v21  ;;  %v895_v63 = vmul.f32 %v879_v19, %v2642_v35 }
 0x16e   :  { %v668_v10 = vmul.f32 0.3275911, %v652_v32  ;;  %v976_v38 = vmul.f32 %v2708_v55, %v896_v54  ;;  %v908_v4 = vsub.f32 0.0, %v652_v32  ;;  %v878_v35 = vadd.f32 0.2548296, %v862_v2 }
 0x16f   :  { %v591_v50 = vpop.f32.mrf.mxu0  ;;  %v770_v27 = vmul.f32 1.0614054, %v2741_v49  ;;  %v833_v1 = vmul.f32 %v817_v47, %v2717_v44  ;;  %v975_v59 = vmul.f32 %v2683_v46, %v895_v63  ;;  %vm1003_vm10 = vcmp.ge.f32.partialorder %v2702_v39, 0.0 }
 0x170   :  { %v1807_v29 = vpop.eup %1806  ;;  %v2748_v5 = vadd.f32 %v2560_v30, %v591_v50  ;;  %v684_v57 = vadd.f32 1.0, %v668_v10  ;;  %v992_v10 = vsub.f32 1.0, %v976_v38  ;;  %v924_v8 = vmul.f32 %v908_v4, %v652_v32 }
 0x171   :  { %v1809_v41 = vpop.eup %1808  ;;  %v715_v58 = vmul.f32 %v1807_v29, %v683_v26  ;;  %v786_v56 = vadd.f32 -1.4531521, %v770_v27  ;;  %v849_v50 = vadd.f32 -0.28449672, %v833_v1  ;;  %v894_v46 = vmul.f32 %v878_v35, %v2619_v22 }
 0x172   :  { %v723_v0 = vmul.f32 %v1809_v41, %v691_v61  ;;  %v2757_v21 = vmul.f32 0.70710677, %v2748_v5  ;;  %v2759_v30 = vpop.eup %1810  ;;  %1814 = vrcp.f32 %v684_v57  ;;  %v991_v34 = vsub.f32 1.0, %v975_v59 }
 0x173   :  { %v802_v55 = vmul.f32 %v786_v56, %v2741_v49  ;;  %v2765_v61 = vpop.eup %1812  ;;  %v731_v19 = vsub.f32 2.0, %v715_v58  ;;  %v865_v54 = vmul.f32 %v849_v50, %v2717_v44  ;;  %v948_v22 = vmul.f32 1.442695, %v924_v8 }
 0x174   :  { %3300 = vst [vmem:[#allocation25_spill] sm:$0xff] %v2757_v21  ;;  %v739_v26 = vsub.f32 2.0, %v723_v0  ;;  %v653_v47 = vand.u32 2147483647, %v2757_v21  ;;  %v946_v0 = vmul.f32 1.442695, %v923_v20 }
 0x175   :  { %v818_v60 = vadd.f32 1.4214138, %v802_v55  ;;  %v881_v56 = vadd.f32 0.2548296, %v865_v54  ;;  %v2775_v38 = vmul.f32 %v1807_v29, %v731_v19  ;;  %v1024_v55 = vsub.f32 0.0, %v992_v10 }
 0x176   :  { %v2769_v27 = vmul.f32 %v1809_v41, %v739_v26  ;;  %v669_v2 = vmul.f32 0.3275911, %v653_v47  ;;  %v909_v1 = vsub.f32 0.0, %v653_v47  ;;  %v962_v41 = vmul.f32 1.442695, %v931_v7 }
 0x177   :  { %v834_v52 = vmul.f32 %v818_v60, %v2741_v49  ;;  %v897_v26 = vmul.f32 %v881_v56, %v2717_v44  ;;  %v2781_v60 = vmul.f32 %v2664_v24, %v894_v46  ;;  %v1023_v19 = vsub.f32 0.0, %v991_v34 }
 0x178   :  { %v685_v63 = vadd.f32 1.0, %v669_v2  ;;  %v771_v58 = vmul.f32 1.0614054, %v2769_v27  ;;  %v1815_v50 = vpop.eup %1814  ;;  %v925_v20 = vmul.f32 %v909_v1, %v653_v47  ;;  %v1040_v47 = vsel %vm1008_vm0, %v992_v10, %v1024_v55 }
 0x179   :  { %v716_v21 = vmul.f32 %v1815_v50, %v684_v57  ;;  %v850_v4 = vadd.f32 -0.28449672, %v834_v52  ;;  %v977_v35 = vmul.f32 %v2735_v17, %v897_v26  ;;  %v763_v17 = vmul.f32 1.0614054, %v2775_v38 }
 0x17a   :  { %1816 = vrcp.f32 %v685_v63  ;;  %v787_v32 = vadd.f32 -1.4531521, %v771_v58  ;;  %v950_v8 = vmul.f32 1.442695, %v925_v20  ;;  %v762_v2 = vmul.f32 1.0614054, %v2754_v43 }
 0x17b   :  { %1818 = vpow2.f32 %v946_v0  ;;  %v732_v29 = vsub.f32 2.0, %v716_v21  ;;  %v866_v44 = vmul.f32 %v850_v4, %v2741_v49  ;;  %v993_v57 = vsub.f32 1.0, %v977_v35 }
 0x17c   :  { %v803_v59 = vmul.f32 %v787_v32, %v2769_v27  ;;  %1820 = vpow2.f32 %v962_v41  ;;  %v990_v21 = vsub.f32 1.0, %v2781_v60  ;;  %v2796_v33 = vsel %vm1007_vm5, %v991_v34, %v1023_v19 }
 0x17d   :  { %v2787_v7 = vmul.f32 %v1815_v50, %v732_v29  ;;  %1822 = vpow2.f32 %v948_v22  ;;  %v882_v24 = vadd.f32 0.2548296, %v866_v44  ;;  %v1025_v56 = vsub.f32 0.0, %v993_v57 }
 0x17e   :  { %v819_v54 = vadd.f32 1.4214138, %v803_v59  ;;  %v779_v10 = vadd.f32 -1.4531521, %v763_v17  ;;  %v2799_v52 = vadd.f32 1.0, %v1040_v47  ;;  %1824 = vpow2.f32 %v950_v8 }
 0x17f   :  { %v898_v58 = vmul.f32 %v882_v24, %v2741_v49  ;;  %v761_v50 = vmul.f32 1.0614054, %v2737_v48  ;;  %v764_v55 = vmul.f32 1.0614054, %v2787_v7  ;;  %v1022_v34 = vsub.f32 0.0, %v990_v21 }
 0x180   :  { %v1817_v1 = vpop.eup %1816  ;;  %v835_v0 = vmul.f32 %v819_v54, %v2769_v27  ;;  %v795_v20 = vmul.f32 %v779_v10, %v2775_v38  ;;  %v778_v49 = vadd.f32 -1.4531521, %v762_v2  ;;  %v1041_v4 = vsel %vm1009_vm6, %v993_v57, %v1025_v56 }
 0x181   :  { %v717_v46 = vmul.f32 %v1817_v1, %v685_v63  ;;  %v2802_v41 = vpop.eup %1818  ;;  %v978_v63 = vmul.f32 %v2765_v61, %v898_v58  ;;  %v780_v35 = vadd.f32 -1.4531521, %v764_v55  ;;  %v777_v47 = vadd.f32 -1.4531521, %v761_v50 }
 0x182   :  { %v851_v26 = vadd.f32 -0.28449672, %v835_v0  ;;  %v1821_v32 = vpop.eup %1820  ;;  %v811_v60 = vadd.f32 1.4214138, %v795_v20  ;;  %v794_v44 = vmul.f32 %v778_v49, %v2754_v43  ;;  %v760_v17 = vmul.f32 1.0614054, %v2715_v18 }
 0x183   :  { %v733_v51 = vsub.f32 2.0, %v717_v46  ;;  %v2811_v29 = vpop.eup %1822  ;;  %v994_v19 = vsub.f32 1.0, %v978_v63  ;;  %v796_v61 = vmul.f32 %v780_v35, %v2787_v7  ;;  %v793_v2 = vmul.f32 %v777_v47, %v2737_v48 }
 0x184   :  { %v867_v22 = vmul.f32 %v851_v26, %v2769_v27  ;;  %v827_v54 = vmul.f32 %v811_v60, %v2775_v38  ;;  %v810_v24 = vadd.f32 1.4214138, %v794_v44  ;;  %v776_v46 = vadd.f32 -1.4531521, %v760_v17 }
 0x185   :  { %v2813_v59 = vmul.f32 %v1817_v1, %v733_v51  ;;  %v1026_v31 = vsub.f32 0.0, %v994_v19  ;;  %v2822_v1 = vpop.eup %1824  ;;  %v812_v56 = vadd.f32 1.4214138, %v796_v61  ;;  %v1038_v58 = vsel %vm1006_vm7, %v990_v21, %v1022_v34 }
 0x186   :  { %v883_v8 = vadd.f32 0.2548296, %v867_v22  ;;  %v843_v10 = vadd.f32 -0.28449672, %v827_v54  ;;  %v826_v26 = vmul.f32 %v810_v24, %v2754_v43  ;;  %v809_v55 = vadd.f32 1.4214138, %v793_v2 }
 0x187   :  { %v765_v57 = vmul.f32 1.0614054, %v2813_v59  ;;  %v1057_v51 = vadd.f32 1.0, %v1041_v4  ;;  %v828_v63 = vmul.f32 %v812_v56, %v2787_v7  ;;  %v792_v60 = vmul.f32 %v776_v46, %v2715_v18 }
 0x188   :  { %v899_v0 = vmul.f32 %v883_v8, %v2769_v27  ;;  %v859_v49 = vmul.f32 %v843_v10, %v2775_v38  ;;  %v842_v35 = vadd.f32 -0.28449672, %v826_v26  ;;  %v825_v27 = vmul.f32 %v809_v55, %v2737_v48 }
 0x189   :  { %v781_v50 = vadd.f32 -1.4531521, %v765_v57  ;;  %v1042_v25 = vsel %vm1010_vm8, %v994_v19, %v1026_v31  ;;  %v844_v21 = vadd.f32 -0.28449672, %v828_v63  ;;  %v808_v8 = vadd.f32 1.4214138, %v792_v60 }
 0x18a   :  { %v979_v20 = vmul.f32 %v1821_v32, %v899_v0  ;;  %v875_v34 = vadd.f32 0.2548296, %v859_v49  ;;  %v858_v32 = vmul.f32 %v842_v35, %v2754_v43  ;;  %v841_v4 = vadd.f32 -0.28449672, %v825_v27 }
 0x18b   :  { %v797_v22 = vmul.f32 %v781_v50, %v2813_v59  ;;  %v860_v54 = vmul.f32 %v844_v21, %v2787_v7  ;;  %v759_v57 = vmul.f32 1.0614054, %v2689_v12  ;;  %v824_v19 = vmul.f32 %v808_v8, %v2715_v18 }
 0x18c   :  { %v995_v44 = vsub.f32 1.0, %v979_v20  ;;  %v891_v17 = vmul.f32 %v875_v34, %v2775_v38  ;;  %v874_v2 = vadd.f32 0.2548296, %v858_v32  ;;  %v857_v13 = vmul.f32 %v841_v4, %v2737_v48 }
 0x18d   :  { %v813_v47 = vadd.f32 1.4214138, %v797_v22  ;;  %v1058_v0 = vadd.f32 1.0, %v1042_v25  ;;  %v876_v56 = vadd.f32 0.2548296, %v860_v54  ;;  %v1073_v34 = vmul.f32 %v1057_v51, %v2691_v28 }
 0x18e   :  { %v1027_v61 = vsub.f32 0.0, %v995_v44  ;;  %v775_v10 = vadd.f32 -1.4531521, %v759_v57  ;;  %v890_v26 = vmul.f32 %v874_v2, %v2754_v43  ;;  %v873_v38 = vadd.f32 0.2548296, %v857_v13 }
 0x18f   :  { %v829_v24 = vmul.f32 %v813_v47, %v2813_v59  ;;  %v892_v55 = vmul.f32 %v876_v56, %v2787_v7  ;;  %v2847_v20 = vmul.f32 %v2802_v41, %v891_v17  ;;  %v840_v63 = vadd.f32 -0.28449672, %v824_v19  ;;  %v3302_v56 = vld [vmem:[#allocation20_spill] sm:$0xff] }
 0x190   :  { %v1043_v31 = vsel %vm1011_vm9, %v995_v44, %v1027_v61  ;;  %v791_v49 = vmul.f32 %v775_v10, %v2689_v12  ;;  %v2853_v35 = vmul.f32 %v2759_v30, %v890_v26  ;;  %v889_v27 = vmul.f32 %v873_v38, %v2737_v48 }
 0x191   :  { %v1059_v46 = vadd.f32 1.0, %v1043_v31  ;;  %v845_v50 = vadd.f32 -0.28449672, %v829_v24  ;;  %v1055_v43 = vadd.f32 1.0, %v2796_v33  ;;  %v972_v60 = vmul.f32 %v2811_v29, %v892_v55  ;;  %v3301_v31 = vld [vmem:[#allocation25_spill] sm:$0xff] }
 0x192   :  { %v856_v7 = vmul.f32 %v840_v63, %v2715_v18  ;;  %v807_v41 = vadd.f32 1.4214138, %v791_v49  ;;  %v1054_v44 = vadd.f32 1.0, %v1038_v58  ;;  %v758_v30 = vmul.f32 1.0614054, %v2686_v37 }
 0x193   :  { %v1075_v22 = vmul.f32 %v1059_v46, %v2743_v53  ;;  %v861_v40 = vmul.f32 %v845_v50, %v2813_v59  ;;  %v1074_v53 = vmul.f32 %v1058_v0, %v2728_v6  ;;  %v988_v21 = vsub.f32 1.0, %v972_v60 }
 0x194   :  { %v987_v48 = vsub.f32 1.0, %v2847_v20  ;;  %v872_v33 = vadd.f32 0.2548296, %v856_v7  ;;  %v823_v29 = vmul.f32 %v807_v41, %v2689_v12  ;;  %v986_v32 = vsub.f32 1.0, %v2853_v35  ;;  %v3303_v20 = vld [vmem:[#allocation23_spill] sm:$0xff]  ;;  %v3304_v7 = vld [vmem:[#allocation24_spill] sm:$0xff] }
 0x195   :  { %1108 = vmatpush.msra.mxu1 %v1075_v22  ;;  %1692 = vmatpush.msra.mxu2 %v1075_v22  ;;  %v877_v25 = vadd.f32 0.2548296, %v861_v40  ;;  %v2868_v6 = vmul.f32 %v2730_v16, %v889_v27  ;;  %v1020_v58 = vsub.f32 0.0, %v988_v21  ;;  %v774_v61 = vadd.f32 -1.4531521, %v758_v30 }
 0x196   :  { %1693 = vmatpush.msrb.mxu3 %v1075_v22  ;;  %v888_v4 = vmul.f32 %v872_v33, %v2715_v18  ;;  %v839_v8 = vadd.f32 -0.28449672, %v823_v29  ;;  %v620_v54 = vmul.f32 0.5, %v2722_v23  ;;  %vm1004_vm12 = vcmp.ge.f32.partialorder %v2733_v14, 0.0  ;;  %v3305_v33 = vld [vmem:[#allocation15_spill] sm:$0xff] }
 0x197   :  { %1109 = vmatpush.msra.mxu1 %v1074_v53  ;;  %1694 = vmatpush.msra.mxu2 %v1074_v53  ;;  %v893_v47 = vmul.f32 %v877_v25, %v2813_v59  ;;  %v1072_v28 = vmul.f32 %v2799_v52, %v2655_v42  ;;  %v621_v59 = vmul.f32 0.5, %v2748_v5  ;;  %v1019_v51 = vsub.f32 0.0, %v987_v48 }
 0x198   :  { %1695 = vmatpush.msrb.mxu3 %v1074_v53  ;;  %v968_v18 = vmul.f32 %v2704_v3, %v888_v4  ;;  %v855_v17 = vmul.f32 %v839_v8, %v2689_v12  ;;  %v1071_v23 = vmul.f32 %v1055_v43, %v2646_v62  ;;  %v985_v24 = vsub.f32 1.0, %v2868_v6  ;;  %v3307_v8 = vld [vmem:[#allocation19_spill] sm:$0xff] }
 0x199   :  { %1110 = vmatpush.msra.mxu1 %v1073_v34  ;;  %1696 = vmatpush.msra.mxu2 %v1073_v34  ;;  %v973_v16 = vmul.f32 %v2822_v1, %v893_v47  ;;  %v790_v42 = vmul.f32 %v774_v61, %v2686_v37  ;;  %v1070_v5 = vmul.f32 %v1054_v44, %v2632_v36  ;;  %v1018_v3 = vsub.f32 0.0, %v986_v32 }
 0x19a   :  { %1697 = vmatpush.msrb.mxu3 %v1073_v34  ;;  %v1036_v52 = vsel %vm1004_vm12, %v988_v21, %v1020_v58  ;;  %v871_v1 = vadd.f32 0.2548296, %v855_v17  ;;  %v984_v13 = vsub.f32 1.0, %v968_v18  ;;  %v757_v19 = vmul.f32 1.0614054, %v2651_v9  ;;  %v3309_v17 = vld [vmem:[#allocation17_spill] sm:$0xff] }
 0x19b   :  { %1111 = vmatpush.msra.mxu1 %v1072_v28  ;;  %1698 = vmatpush.msra.mxu2 %v1072_v28  ;;  %v989_v57 = vsub.f32 1.0, %v973_v16  ;;  %v806_v62 = vadd.f32 1.4214138, %v790_v42  ;;  %vm1005_vm15 = vcmp.ge.f32.partialorder %v3301_v31, 0.0  ;;  %v1035_v0 = vsel %vm1003_vm10, %v987_v48, %v1019_v51  ;;  %v3311_v42 = vld [vmem:[#allocation16_spill] sm:$0xff] }
 0x19c   :  { %1699 = vmatpush.msrb.mxu3 %v1072_v28  ;;  %v887_v36 = vmul.f32 %v871_v1, %v2689_v12  ;;  %v756_v14 = vmul.f32 1.0614054, %v3302_v56  ;;  %v1017_v46 = vsub.f32 0.0, %v985_v24  ;;  %v773_v26 = vadd.f32 -1.4531521, %v757_v19 }
 0x19d   :  { %1112 = vmatpush.msra.mxu1 %v1071_v23  ;;  %1700 = vmatpush.msra.mxu2 %v1071_v23  ;;  %v1021_v2 = vsub.f32 0.0, %v989_v57  ;;  %v822_v50 = vmul.f32 %v806_v62, %v2686_v37  ;;  %v1052_v55 = vadd.f32 1.0, %v1036_v52  ;;  %v1034_v39 = vsel %vm1002_vm11, %v986_v32, %v1018_v3 }
 0x19e   :  { %1701 = vmatpush.msrb.mxu3 %v1071_v23  ;;  %v967_v63 = vmul.f32 %v3303_v20, %v887_v36  ;;  %v772_v49 = vadd.f32 -1.4531521, %v756_v14  ;;  %v1016_v22 = vsub.f32 0.0, %v984_v13  ;;  %v789_v40 = vmul.f32 %v773_v26, %v2651_v9  ;;  %v3310_v23 = vld [vmem:[#allocation22_spill] sm:$0xff]  ;;  %v3314_v20 = vld [vmem:[#allocation12_spill] sm:$0xff] }
 0x19f   :  { %1113 = vmatpush.msra.mxu1 %v1070_v5  ;;  %1702 = vmatpush.msra.mxu2 %v1070_v5  ;;  %v1037_v10 = vsel %vm1005_vm15, %v989_v57, %v1021_v2  ;;  %v838_v12 = vadd.f32 -0.28449672, %v822_v50  ;;  %v1051_v27 = vadd.f32 1.0, %v1035_v0  ;;  %v619_v41 = vmul.f32 0.5, %v3304_v7 }
 0x1a0   :  { %1703 = vmatpush.msrb.mxu3 %v1070_v5  ;;  %v1053_v38 = vadd.f32 1.0, %v1037_v10  ;;  %v983_v43 = vsub.f32 1.0, %v967_v63  ;;  %v788_v60 = vmul.f32 %v772_v49, %v3302_v56  ;;  %v1033_v53 = vsel %vm1001_vm13, %v985_v24, %v1017_v46  ;;  %v3313_v10 = vld [vmem:[#allocation13_spill] sm:$0xff] }
 0x1a1   :  { %v854_v44 = vmul.f32 %v838_v12, %v2686_v37  ;;  %v805_v25 = vadd.f32 1.4214138, %v789_v40  ;;  %v1068_v15 = vmul.f32 %v1052_v55, %v620_v54  ;;  %v1050_v30 = vadd.f32 1.0, %v1034_v39 }
 0x1a2   :  { %v1069_v35 = vmul.f32 %v1053_v38, %v621_v59  ;;  %v1015_v21 = vsub.f32 0.0, %v983_v43  ;;  %v804_v48 = vadd.f32 1.4214138, %v788_v60  ;;  %vm999_vm1 = vcmp.ge.f32.partialorder %v3305_v33, 0.0  ;;  %v3317_v60 = vld [vmem:[#allocation9_spill] sm:$0xff]  ;;  %v1083_v33 = vld [vmem:[%s3250_s5 + $0x38] sm:$0xff] }
 0x1a3   :  { %v1032_v29 = vsel %vm1000_vm14, %v984_v13, %v1016_v22  ;;  %v870_v34 = vadd.f32 0.2548296, %v854_v44  ;;  %v821_v47 = vmul.f32 %v805_v25, %v2651_v9  ;;  %v618_v32 = vmul.f32 0.5, %v3306_v45  ;;  %v3312_v13 = vld [vmem:[#allocation14_spill] sm:$0xff]  ;;  %v3318_v25 = vld [vmem:[#allocation8_spill] sm:$0xff]  ;;  %v1091_v45 = vld [vmem:[%s3250_s5 + $0x78] sm:$0xff] }
 0x1a4   :  { %1114 = vmatpush.msra.mxu1 %v1069_v35  ;;  %1704 = vmatpush.msra.mxu2 %v1069_v35  ;;  %v1067_v6 = vmul.f32 %v1051_v27, %v619_v41  ;;  %v1049_v58 = vadd.f32 1.0, %v1033_v53  ;;  %v820_v4 = vmul.f32 %v804_v48, %v3302_v56  ;;  %1826 = vpow2.f32 %v3307_v8  ;;  %v3316_v27 = vld [vmem:[#allocation10_spill] sm:$0xff]  ;;  %v1076_v48 = vld [vmem:[%s3250_s5] sm:$0xff] }
 0x1a5   :  { %1705 = vmatpush.msrb.mxu3 %v1069_v35  ;;  %v1031_v61 = vsel %vm999_vm1, %v983_v43, %v1015_v21  ;;  %v886_v54 = vmul.f32 %v870_v34, %v2686_v37  ;;  %v837_v28 = vadd.f32 -0.28449672, %v821_v47  ;;  %v617_v16 = vmul.f32 0.5, %v3308_v11  ;;  %v3315_v35 = vld [vmem:[#allocation11_spill] sm:$0xff]  ;;  %v1077_v34 = vld [vmem:[%s3250_s5 + $0x8] sm:$0xff]  ;;  %v1084_v47 = vld [vmem:[%s3250_s5 + $0x40] sm:$0xff] }
 0x1a6   :  { %1115 = vmatpush.msra.mxu1 %v1068_v15  ;;  %1706 = vmatpush.msra.mxu2 %v1068_v15  ;;  %v1066_v59 = vmul.f32 %v1050_v30, %v618_v32  ;;  %v1048_v51 = vadd.f32 1.0, %v1032_v29  ;;  %v836_v18 = vadd.f32 -0.28449672, %v820_v4  ;;  %1828 = vpow2.f32 %v3309_v17  ;;  %v1090_v29 = vld [vmem:[%s3250_s5 + $0x70] sm:$0xff]  ;;  %v1080_v8 = vld [vmem:[%s3250_s5 + $0x20] sm:$0xff] }
 0x1a7   :  { %1707 = vmatpush.msrb.mxu3 %v1068_v15  ;;  %v966_v57 = vmul.f32 %v3310_v23, %v886_v54  ;;  %v853_v24 = vmul.f32 %v837_v28, %v2651_v9  ;;  %v616_v5 = vmul.f32 0.5, %v3311_v42  ;;  %v1065_v37 = vmul.f32 %v1049_v58, %v617_v16  ;;  %v1078_v32 = vld [vmem:[%s3250_s5 + $0x10] sm:$0xff]  ;;  %v1079_v58 = vld [vmem:[%s3250_s5 + $0x18] sm:$0xff]  ;;  %v1081_v54 = vld [vmem:[%s3250_s5 + $0x28] sm:$0xff] }
 0x1a8   :  { %1116 = vmatpush.msra.mxu1 %v1067_v6  ;;  %1708 = vmatpush.msra.mxu2 %v1067_v6  ;;  %v1047_v52 = vadd.f32 1.0, %v1031_v61  ;;  %v852_v3 = vmul.f32 %v836_v18, %v3302_v56  ;;  %v615_v62 = vmul.f32 0.5, %v3312_v13  ;;  %vm998_vm2 = vcmp.ge.f32.partialorder %v3313_v10, 0.0  ;;  %v1086_v4 = vld [vmem:[%s3250_s5 + $0x50] sm:$0xff]  ;;  %v1087_v61 = vld [vmem:[%s3250_s5 + $0x58] sm:$0xff]  ;;  %v1088_v28 = vld [vmem:[%s3250_s5 + $0x60] sm:$0xff] }
 0x1a9   :  { %1709 = vmatpush.msrb.mxu3 %v1067_v6  ;;  %v982_v1 = vsub.f32 1.0, %v966_v57  ;;  %v869_v2 = vadd.f32 0.2548296, %v853_v24  ;;  %v1064_v19 = vmul.f32 %v1048_v51, %v616_v5  ;;  %v614_v63 = vmul.f32 0.5, %v3314_v20  ;;  %v1085_v6 = vld [vmem:[%s3250_s5 + $0x48] sm:$0xff]  ;;  %v1082_v11 = vld [vmem:[%s3250_s5 + $0x30] sm:$0xff] }
 0x1aa   :  { %1117 = vmatpush.msra.mxu1 %v1066_v59  ;;  %1710 = vmatpush.msra.mxu2 %v1066_v59  ;;  %v868_v31 = vadd.f32 0.2548296, %v852_v3  ;;  %v1827_v0 = vpop.eup %1826  ;;  %v1063_v46 = vmul.f32 %v1047_v52, %v615_v62  ;;  %vm997_vm3 = vcmp.ge.f32.partialorder %v3315_v35, 0.0  ;;  %vm996_vm4 = vcmp.ge.f32.partialorder %v3316_v27, 0.0  ;;  %v1089_v16 = vld [vmem:[%s3250_s5 + $0x68] sm:$0xff]  ;;  %v1099_v52 = vld [vmem:[#allocation2 + $0x38] sm:$0xff] }
 0x1ab   :  { %1711 = vmatpush.msrb.mxu3 %v1066_v59  ;;  %v1014_v36 = vsub.f32 0.0, %v982_v1  ;;  %v885_v14 = vmul.f32 %v869_v2, %v2651_v9  ;;  %v613_v7 = vmul.f32 0.5, %v3317_v60  ;;  %v612_v15 = vmul.f32 0.5, %v3318_v25  ;;  %v1092_v59 = vld [vmem:[#allocation2] sm:$0xff]  ;;  %v1106_v35 = vld [vmem:[#allocation2 + $0x70] sm:$0xff]  ;;  %s1950_s5 = smov [#allocation5]  }
 0x1ac   :  { %1118 = vmatpush.msra.mxu1 %v1065_v37  ;;  %1712 = vmatpush.msra.mxu2 %v1065_v37  ;;  %v884_v50 = vmul.f32 %v868_v31, %v3302_v56  ;;  %v1829_v26 = vpop.eup %1828  ;;  %s1657_s10 = sshll.u32 %s1950_s5, 4  ;;  %s1658_s10 = int_to_ptr.vmem [resolvable:$true] %s1657_s10 }
 0x1ad   :  { %1713 = vmatpush.msrb.mxu3 %v1065_v37  ;;  %v1030_v38 = vsel %vm998_vm2, %v982_v1, %v1014_v36  ;;  %v965_v55 = vmul.f32 %v1827_v0, %v885_v14 }
 0x1ae   :  { %1119 = vmatpush.msra.mxu1 %v1064_v19  ;;  %1714 = vmatpush.msra.mxu2 %v1064_v19  ;;  %v1046_v49 = vadd.f32 1.0, %v1030_v38  ;;  %v964_v39 = vmul.f32 %v1829_v26, %v884_v50 }
 0x1af   :  { %1715 = vmatpush.msrb.mxu3 %v1064_v19  ;;  %v981_v22 = vsub.f32 1.0, %v965_v55 }
 0x1b0   :  { %1120 = vmatpush.msra.mxu1 %v1063_v46  ;;  %1716 = vmatpush.msra.mxu2 %v1063_v46  ;;  %v1062_v9 = vmul.f32 %v1046_v49, %v614_v63  ;;  %v980_v12 = vsub.f32 1.0, %v964_v39 }
 0x1b1   :  { %1717 = vmatpush.msrb.mxu3 %v1063_v46  ;;  %v1013_v40 = vsub.f32 0.0, %v981_v22 }
 0x1b2   :  { %1121 = vmatpush.msra.mxu1 %v1062_v9  ;;  %1718 = vmatpush.msra.mxu2 %v1062_v9  ;;  %v1012_v56 = vsub.f32 0.0, %v980_v12 }
 0x1b3   :  { %1719 = vmatpush.msrb.mxu3 %v1062_v9  ;;  %v1029_v43 = vsel %vm997_vm3, %v981_v22, %v1013_v40 }
 0x1b4   :  { %v1045_v41 = vadd.f32 1.0, %v1029_v43  ;;  %v1028_v53 = vsel %vm996_vm4, %v980_v12, %v1012_v56 }
 0x1b5   :  { %v1044_v44 = vadd.f32 1.0, %v1028_v53 }
 0x1b6   :  { %v1061_v30 = vmul.f32 %v1045_v41, %v613_v7 }
 0x1b7   :  { %v1060_v21 = vmul.f32 %v1044_v44, %v612_v15 }
 0x1b8   :  { %1122 = vmatpush.msra.mxu1 %v1061_v30  ;;  %1720 = vmatpush.msra.mxu2 %v1061_v30 }
 0x1b9   :  { %1721 = vmatpush.msrb.mxu3 %v1061_v30 }
 0x1ba   :  { %1123 = vmatpush.msra.mxu1 %v1060_v21  ;;  %1722 = vmatpush.msra.mxu2 %v1060_v21 }
 0x1bb   :  { %1723 = vmatpush.msrb.mxu3 %v1060_v21  ;;  %1124 = vmatmul.f32.vlgmr.msra.gmra.mxu1 %v1076_v48 }
 0x1bc   :  { %1145 = vmatmul.f32.vlgmr.msra.gmra.mxu2 %v1083_v33  ;;  %1166 = vmatmul.f32.vlgmr.msrb.gmra.mxu3 %v1090_v29 }
 0x1c3   :  { %1127 = vmatmul.f32.gmra.mxu1 %v1077_v34 }
 0x1c4   :  { %1148 = vmatmul.f32.gmra.mxu2 %v1084_v47  ;;  %1169 = vmatmul.f32.gmra.mxu3 %v1091_v45 }
 0x1cb   :  { %1130 = vmatmul.f32.gmra.mxu1 %v1078_v32 }
 0x1cc   :  { %1151 = vmatmul.f32.gmra.mxu2 %v1085_v6 }
 0x1d3   :  { %1133 = vmatmul.f32.gmra.mxu1 %v1079_v58 }
 0x1d4   :  { %1154 = vmatmul.f32.gmra.mxu2 %v1086_v4 }
 0x1db   :  { %1136 = vmatmul.f32.gmra.mxu1 %v1080_v8 }
 0x1dc   :  { %1157 = vmatmul.f32.gmra.mxu2 %v1087_v61 }
 0x1e3   :  { %1139 = vmatmul.f32.gmra.mxu1 %v1081_v54 }
 0x1e4   :  { %1160 = vmatmul.f32.gmra.mxu2 %v1088_v28 }
 0x1eb   :  { %1142 = vmatmul.f32.gmra.mxu1 %v1082_v11 }
 0x1ec   :  { %1163 = vmatmul.f32.gmra.mxu2 %v1089_v16 }
 0x238   :  { %v1125_v51 = vpop.f32.mrf.mxu1 }
 0x239   :  { %v1126_v18 = vadd.f32 %v1125_v51, %v1092_v59 }
 0x23b   :  { %v1189_v17 = vmul.f32 0.70710677, %v1126_v18  ;;  %v1173_v48 = vmul.f32 0.5, %v1126_v18 }
 0x23d   :  { %v1205_v23 = vand.u32 2147483647, %v1189_v17  ;;  %vm1557_vm0 = vcmp.ge.f32.partialorder %v1189_v17, 0.0  ;;  %v1093_v17 = vld [vmem:[#allocation2 + $0x8] sm:$0xff] }
 0x23f   :  { %v1221_v57 = vmul.f32 0.3275911, %v1205_v23  ;;  %v1146_v3 = vpop.f32.mrf.mxu2  ;;  %v1461_v13 = vsub.f32 0.0, %v1205_v23  ;;  %v1167_v56 = vpop.f32.mrf.mxu3 }
 0x240   :  { %v2975_v2 = vadd.f32 %v1146_v3, %v1099_v52  ;;  %v2981_v43 = vadd.f32 %v1167_v56, %v1106_v35  ;;  %v1094_v56 = vld [vmem:[#allocation2 + $0x10] sm:$0xff] }
 0x241   :  { %v1237_v24 = vadd.f32 1.0, %v1221_v57  ;;  %v1477_v36 = vmul.f32 %v1461_v13, %v1205_v23  ;;  %v1128_v23 = vpop.f32.mrf.mxu1 }
 0x242   :  { %v2978_v19 = vmul.f32 0.70710677, %v2975_v2  ;;  %v2984_v53 = vmul.f32 0.70710677, %v2981_v43 }
 0x243   :  { %1830 = vrcp.f32 %v1237_v24  ;;  %v1493_v26 = vmul.f32 1.442695, %v1477_v36 }
 0x244   :  { %v1212_v0 = vand.u32 2147483647, %v2978_v19  ;;  %v1219_v15 = vand.u32 2147483647, %v2984_v53  ;;  %vm1564_vm5 = vcmp.ge.f32.partialorder %v2978_v19, 0.0  ;;  %v1100_v19 = vld [vmem:[#allocation2 + $0x40] sm:$0xff] }
 0x245   :  { %vm1571_vm6 = vcmp.ge.f32.partialorder %v2984_v53, 0.0 }
 0x246   :  { %v1228_v10 = vmul.f32 0.3275911, %v1212_v0  ;;  %v1468_v7 = vsub.f32 0.0, %v1212_v0  ;;  %v1235_v34 = vmul.f32 0.3275911, %v1219_v15  ;;  %v1475_v18 = vsub.f32 0.0, %v1219_v15 }
 0x248   :  { %v1244_v50 = vadd.f32 1.0, %v1228_v10  ;;  %v1484_v21 = vmul.f32 %v1468_v7, %v1212_v0  ;;  %v1251_v32 = vadd.f32 1.0, %v1235_v34  ;;  %v1491_v3 = vmul.f32 %v1475_v18, %v1219_v15 }
 0x249   :  { %v1831_v42 = vpop.eup %1830 }
 0x24a   :  { %v1269_v5 = vmul.f32 %v1831_v42, %v1237_v24  ;;  %1832 = vrcp.f32 %v1244_v50  ;;  %v1507_v6 = vmul.f32 1.442695, %v1484_v21  ;;  %v2987_v24 = vadd.f32 %v1128_v23, %v1093_v17 }
 0x24b   :  { %1834 = vpow2.f32 %v1493_v26  ;;  %v1521_v10 = vmul.f32 1.442695, %v1491_v3 }
 0x24c   :  { %v1285_v37 = vsub.f32 2.0, %v1269_v5  ;;  %1836 = vrcp.f32 %v1251_v32 }
 0x24d   :  { %1838 = vpow2.f32 %v1507_v6 }
 0x24e   :  { %v1301_v1 = vmul.f32 %v1831_v42, %v1285_v37  ;;  %v2990_v37 = vmul.f32 0.70710677, %v2987_v24 }
 0x250   :  { %v1317_v62 = vmul.f32 1.0614054, %v1301_v1  ;;  %v1833_v63 = vpop.eup %1832  ;;  %v1206_v13 = vand.u32 2147483647, %v2990_v37  ;;  %vm1558_vm7 = vcmp.ge.f32.partialorder %v2990_v37, 0.0 }
 0x251   :  { %v1276_v39 = vmul.f32 %v1833_v63, %v1244_v50  ;;  %v1835_v9 = vpop.eup %1834 }
 0x252   :  { %v1333_v31 = vadd.f32 -1.4531521, %v1317_v62  ;;  %v1837_v61 = vpop.eup %1836 }
 0x253   :  { %v1292_v12 = vsub.f32 2.0, %v1276_v39  ;;  %v1283_v28 = vmul.f32 %v1837_v61, %v1251_v32  ;;  %v1839_v16 = vpop.eup %1838  ;;  %v1170_v39 = vpop.f32.mrf.mxu3 }
 0x254   :  { %v1349_v14 = vmul.f32 %v1333_v31, %v1301_v1  ;;  %v1180_v31 = vmul.f32 0.5, %v2975_v2 }
 0x255   :  { %v1308_v27 = vmul.f32 %v1833_v63, %v1292_v12  ;;  %v1299_v59 = vsub.f32 2.0, %v1283_v28  ;;  %v1149_v63 = vpop.f32.mrf.mxu2 }
 0x256   :  { %v1365_v46 = vadd.f32 1.4214138, %v1349_v14  ;;  %v1222_v14 = vmul.f32 0.3275911, %v1206_v13  ;;  %v2995_v2 = vadd.f32 %v1149_v63, %v1100_v19 }
 0x257   :  { %v1324_v41 = vmul.f32 1.0614054, %v1308_v27  ;;  %v1315_v57 = vmul.f32 %v1837_v61, %v1299_v59 }
 0x258   :  { %v1381_v38 = vmul.f32 %v1365_v46, %v1301_v1  ;;  %v1238_v26 = vadd.f32 1.0, %v1222_v14  ;;  %v3000_v7 = vmul.f32 0.70710677, %v2995_v2 }
 0x259   :  { %v1340_v25 = vadd.f32 -1.4531521, %v1324_v41  ;;  %v1331_v5 = vmul.f32 1.0614054, %v1315_v57 }
 0x25a   :  { %v1397_v55 = vadd.f32 -0.28449672, %v1381_v38  ;;  %1840 = vrcp.f32 %v1238_v26  ;;  %v1213_v21 = vand.u32 2147483647, %v3000_v7  ;;  %vm1565_vm8 = vcmp.ge.f32.partialorder %v3000_v7, 0.0 }
 0x25b   :  { %v1356_v29 = vmul.f32 %v1340_v25, %v1308_v27  ;;  %1842 = vpow2.f32 %v1521_v10 }
 0x25c   :  { %v1413_v20 = vmul.f32 %v1397_v55, %v1301_v1 }
 0x25d   :  { %v1372_v45 = vadd.f32 1.4214138, %v1356_v29 }
 0x25e   :  { %v1429_v49 = vadd.f32 0.2548296, %v1413_v20 }
 0x25f   :  { %v1388_v58 = vmul.f32 %v1372_v45, %v1308_v27 }
 0x260   :  { %v1445_v22 = vmul.f32 %v1429_v49, %v1301_v1  ;;  %v1347_v1 = vadd.f32 -1.4531521, %v1331_v5  ;;  %v1107_v49 = vld [vmem:[#allocation2 + $0x78] sm:$0xff] }
 0x261   :  { %v1404_v4 = vadd.f32 -0.28449672, %v1388_v58  ;;  %v2997_v12 = vadd.f32 %v1170_v39, %v1107_v49  ;;  %v1101_v58 = vld [vmem:[#allocation2 + $0x48] sm:$0xff] }
 0x262   :  { %v1525_v40 = vmul.f32 %v1835_v9, %v1445_v22  ;;  %v1363_v36 = vmul.f32 %v1347_v1, %v1315_v57  ;;  %v1841_v22 = vpop.eup %1840 }
 0x263   :  { %v1420_v8 = vmul.f32 %v1404_v4, %v1308_v27  ;;  %v1270_v35 = vmul.f32 %v1841_v22, %v1238_v26  ;;  %v3003_v41 = vmul.f32 0.70710677, %v2997_v12  ;;  %v1152_v4 = vpop.f32.mrf.mxu2 }
 0x264   :  { %v1541_v60 = vsub.f32 1.0, %v1525_v40  ;;  %v1379_v50 = vadd.f32 1.4214138, %v1363_v36  ;;  %v1843_v40 = vpop.eup %1842  ;;  %v3020_v59 = vadd.f32 %v1152_v4, %v1101_v58 }
 0x265   :  { %v1436_v54 = vadd.f32 0.2548296, %v1420_v8  ;;  %vm1572_vm9 = vcmp.ge.f32.partialorder %v3003_v41, 0.0 }
 0x266   :  { %v1573_v44 = vsub.f32 0.0, %v1541_v60  ;;  %v1395_v38 = vmul.f32 %v1379_v50, %v1315_v57  ;;  %v3025_v53 = vmul.f32 0.70710677, %v3020_v59 }
 0x267   :  { %v1452_v11 = vmul.f32 %v1436_v54, %v1308_v27  ;;  %v1131_v27 = vpop.f32.mrf.mxu1 }
 0x268   :  { %v1589_v30 = vsel %vm1557_vm0, %v1541_v60, %v1573_v44  ;;  %v1411_v55 = vadd.f32 -0.28449672, %v1395_v38  ;;  %v1286_v44 = vsub.f32 2.0, %v1270_v35  ;;  %v3005_v25 = vadd.f32 %v1131_v27, %v1094_v56 }
 0x269   :  { %v1605_v33 = vadd.f32 1.0, %v1589_v30  ;;  %v1532_v51 = vmul.f32 %v1839_v16, %v1452_v11  ;;  %v1462_v30 = vsub.f32 0.0, %v1206_v13  ;;  %vm1566_vm11 = vcmp.ge.f32.partialorder %v3025_v53, 0.0 }
 0x26a   :  { %v1427_v20 = vmul.f32 %v1411_v55, %v1315_v57  ;;  %v3014_v29 = vmul.f32 0.70710677, %v3005_v25 }
 0x26b   :  { %v1621_v47 = vmul.f32 %v1605_v33, %v1173_v48  ;;  %v1548_v42 = vsub.f32 1.0, %v1532_v51  ;;  %v3009_v48 = vand.u32 2147483647, %v3003_v41  ;;  %v3011_v33 = vmul.f32 %v1841_v22, %v1286_v44  ;;  %v1155_v44 = vpop.f32.mrf.mxu2 }
 0x26c   :  { %v1443_v9 = vadd.f32 0.2548296, %v1427_v20  ;;  %v1207_v6 = vand.u32 2147483647, %v3014_v29  ;;  %v1478_v61 = vmul.f32 %v1462_v30, %v1206_v13  ;;  %v1187_v51 = vmul.f32 0.5, %v2981_v43 }
 0x26d   :  { %1637 = vst [vmem:[#allocation5] sm:$0xff] %v1621_v47  ;;  %v1580_v52 = vsub.f32 0.0, %v1548_v42  ;;  %v1229_v47 = vmul.f32 0.3275911, %v1213_v21  ;;  %v1236_v45 = vmul.f32 0.3275911, %v3009_v48 }
 0x26e   :  { %v1459_v60 = vmul.f32 %v1443_v9, %v1315_v57  ;;  %v1318_v32 = vmul.f32 1.0614054, %v3011_v33  ;;  %v1223_v16 = vmul.f32 0.3275911, %v1207_v6  ;;  %v1469_v13 = vsub.f32 0.0, %v1213_v21 }
 0x26f   :  { %v1596_v62 = vsel %vm1564_vm5, %v1548_v42, %v1580_v52  ;;  %v1245_v54 = vadd.f32 1.0, %v1229_v47  ;;  %v1252_v28 = vadd.f32 1.0, %v1236_v45  ;;  %v1095_v42 = vld [vmem:[#allocation2 + $0x18] sm:$0xff]  ;;  %v1134_v5 = vpop.f32.mrf.mxu1  ;;  %v1495_v52 = vmul.f32 1.442695, %v1478_v61 }
 0x270   :  { %v1612_v0 = vadd.f32 1.0, %v1596_v62  ;;  %v1539_v15 = vmul.f32 %v1843_v40, %v1459_v60  ;;  %v1334_v11 = vadd.f32 -1.4531521, %v1318_v32  ;;  %v1239_v57 = vadd.f32 1.0, %v1223_v16  ;;  %v1102_v60 = vld [vmem:[#allocation2 + $0x50] sm:$0xff] }
 0x271   :  { %1844 = vrcp.f32 %v1245_v54  ;;  %v3027_v62 = vadd.f32 %v1134_v5, %v1095_v42  ;;  %v1485_v26 = vmul.f32 %v1469_v13, %v1213_v21  ;;  %v1463_v55 = vsub.f32 0.0, %v1207_v6 }
 0x272   :  { %v1628_v46 = vmul.f32 %v1612_v0, %v1180_v31  ;;  %v1555_v34 = vsub.f32 1.0, %v1539_v15  ;;  %v1350_v23 = vmul.f32 %v1334_v11, %v3011_v33  ;;  %1846 = vrcp.f32 %v1252_v28 }
 0x273   :  { %1848 = vrcp.f32 %v1239_v57  ;;  %v3031_v31 = vand.u32 2147483647, %v3025_v53  ;;  %v3034_v36 = vmul.f32 0.70710677, %v3027_v62  ;;  %v3042_v22 = vmul.f32 0.5, %v2987_v24 }
 0x274   :  { %1644 = vst [vmem:[#allocation5 + $0x38] sm:$0xff] %v1628_v46  ;;  %v1587_v8 = vsub.f32 0.0, %v1555_v34  ;;  %v1366_v1 = vadd.f32 1.4214138, %v1350_v23  ;;  %1850 = vpow2.f32 %v1495_v52  ;;  %v1476_v40 = vsub.f32 0.0, %v3009_v48  ;;  %v1096_v52 = vld [vmem:[#allocation2 + $0x20] sm:$0xff] }
 0x275   :  { %v1230_v50 = vmul.f32 0.3275911, %v3031_v31  ;;  %v3038_v20 = vand.u32 2147483647, %v3034_v36  ;;  %v1509_v15 = vmul.f32 1.442695, %v1485_v26  ;;  %v1479_v21 = vmul.f32 %v1463_v55, %v1207_v6 }
 0x276   :  { %v1603_v18 = vsel %vm1571_vm6, %v1555_v34, %v1587_v8  ;;  %v1382_v43 = vmul.f32 %v1366_v1, %v3011_v33  ;;  %v1492_v4 = vmul.f32 %v1476_v40, %v3009_v48  ;;  %v3055_v61 = vadd.f32 %v1155_v44, %v1102_v60 }
 0x277   :  { %v1619_v17 = vadd.f32 1.0, %v1603_v18  ;;  %v1845_v0 = vpop.eup %1844  ;;  %v1246_v39 = vadd.f32 1.0, %v1230_v50  ;;  %v1224_v34 = vmul.f32 0.3275911, %v3038_v20  ;;  %v3058_v6 = vmul.f32 0.5, %v2995_v2 }
 0x278   :  { %v1847_v14 = vpop.eup %1846  ;;  %v1398_v10 = vadd.f32 -0.28449672, %v1382_v43  ;;  %v1277_v46 = vmul.f32 %v1845_v0, %v1245_v54  ;;  %v3063_v16 = vmul.f32 0.5, %v3005_v25  ;;  %v1523_v2 = vmul.f32 1.442695, %v1492_v4 }
 0x279   :  { %v1635_v3 = vmul.f32 %v1619_v17, %v1187_v51  ;;  %v1284_v38 = vmul.f32 %v1847_v14, %v1252_v28  ;;  %v1849_v19 = vpop.eup %1848  ;;  %1852 = vrcp.f32 %v1246_v39  ;;  %v1240_v8 = vadd.f32 1.0, %v1224_v34 }
 0x27a   :  { %v1414_v63 = vmul.f32 %v1398_v10, %v3011_v33  ;;  %v1293_v49 = vsub.f32 2.0, %v1277_v46  ;;  %v1271_v27 = vmul.f32 %v1849_v19, %v1239_v57  ;;  %v1851_v47 = vpop.eup %1850  ;;  %1854 = vpow2.f32 %v1509_v15 }
 0x27b   :  { %1651 = vst [vmem:[#allocation5 + $0x70] sm:$0xff] %v1635_v3  ;;  %v1300_v9 = vsub.f32 2.0, %v1284_v38  ;;  %v1497_v51 = vmul.f32 1.442695, %v1479_v21  ;;  %1856 = vrcp.f32 %v1240_v8  ;;  %v3069_v5 = vmul.f32 0.70710677, %v3055_v61  ;;  %v1137_v3 = vpop.f32.mrf.mxu1 }
 0x27c   :  { %v1430_v35 = vadd.f32 0.2548296, %v1414_v63  ;;  %v3045_v56 = vmul.f32 %v1845_v0, %v1293_v49  ;;  %v1287_v32 = vsub.f32 2.0, %v1271_v27  ;;  %v1470_v43 = vsub.f32 0.0, %v3031_v31 }
 0x27d   :  { %v3047_v30 = vmul.f32 %v1847_v14, %v1300_v9  ;;  %1858 = vpow2.f32 %v1497_v51  ;;  %v3073_v10 = vand.u32 2147483647, %v3069_v5  ;;  %v3079_v38 = vadd.f32 %v1137_v3, %v1096_v52 }
 0x27e   :  { %v1446_v24 = vmul.f32 %v1430_v35, %v3011_v33  ;;  %v1325_v45 = vmul.f32 1.0614054, %v3045_v56  ;;  %v3060_v11 = vmul.f32 %v1849_v19, %v1287_v32  ;;  %1860 = vpow2.f32 %v1523_v2 }
 0x27f   :  { %v1332_v58 = vmul.f32 1.0614054, %v3047_v30  ;;  %v1853_v18 = vpop.eup %1852  ;;  %v1486_v37 = vmul.f32 %v1470_v43, %v3031_v31  ;;  %v3093_v31 = vmul.f32 0.70710677, %v3079_v38  ;;  %vm1559_vm10 = vcmp.ge.f32.partialorder %v3014_v29, 0.0 }
 0x280   :  { %v1526_v54 = vmul.f32 %v1851_v47, %v1446_v24  ;;  %v1341_v28 = vadd.f32 -1.4531521, %v1325_v45  ;;  %v1319_v23 = vmul.f32 1.0614054, %v3060_v11  ;;  %v1278_v42 = vmul.f32 %v1853_v18, %v1246_v39  ;;  %v1855_v55 = vpop.eup %1854 }
 0x281   :  { %v1348_v33 = vadd.f32 -1.4531521, %v1332_v58  ;;  %v1231_v39 = vmul.f32 0.3275911, %v3073_v10  ;;  %v1857_v9 = vpop.eup %1856  ;;  %v1464_v47 = vsub.f32 0.0, %v3038_v20  ;;  %vm1560_vm12 = vcmp.ge.f32.partialorder %v3034_v36, 0.0 }
 0x282   :  { %v1542_v17 = vsub.f32 1.0, %v1526_v54  ;;  %v1357_v48 = vmul.f32 %v1341_v28, %v3045_v56  ;;  %v1335_v13 = vadd.f32 -1.4531521, %v1319_v23  ;;  %v1294_v14 = vsub.f32 2.0, %v1278_v42  ;;  %v1103_v42 = vld [vmem:[#allocation2 + $0x58] sm:$0xff] }
 0x283   :  { %v1364_v57 = vmul.f32 %v1348_v33, %v3047_v30  ;;  %v1272_v15 = vmul.f32 %v1857_v9, %v1240_v8  ;;  %v1247_v24 = vadd.f32 1.0, %v1231_v39  ;;  %v1859_v45 = vpop.eup %1858  ;;  %v1511_v28 = vmul.f32 1.442695, %v1486_v37  ;;  %v1140_v41 = vpop.f32.mrf.mxu1 }
 0x284   :  { %v1574_v1 = vsub.f32 0.0, %v1542_v17  ;;  %v1373_v25 = vadd.f32 1.4214138, %v1357_v48  ;;  %v1351_v26 = vmul.f32 %v1335_v13, %v3060_v11  ;;  %v3082_v49 = vmul.f32 %v1853_v18, %v1294_v14  ;;  %v1158_v13 = vpop.f32.mrf.mxu2 }
 0x285   :  { %v1380_v0 = vadd.f32 1.4214138, %v1364_v57  ;;  %v1288_v4 = vsub.f32 2.0, %v1272_v15  ;;  %1862 = vrcp.f32 %v1247_v24  ;;  %v3100_v18 = vand.u32 2147483647, %v3093_v31 }
 0x286   :  { %v1590_v46 = vsel %vm1558_vm7, %v1542_v17, %v1574_v1  ;;  %v1389_v50 = vmul.f32 %v1373_v25, %v3045_v56  ;;  %v1367_v35 = vadd.f32 1.4214138, %v1351_v26  ;;  %v1326_v44 = vmul.f32 1.0614054, %v3082_v49  ;;  %v1861_v17 = vpop.eup %1860 }
 0x287   :  { %v1606_v19 = vadd.f32 1.0, %v1590_v46  ;;  %v1396_v63 = vmul.f32 %v1380_v0, %v3047_v30  ;;  %v3097_v51 = vmul.f32 %v1857_v9, %v1288_v4  ;;  %v1188_v23 = vmul.f32 0.5, %v2997_v12 }
 0x288   :  { %v1405_v40 = vadd.f32 -0.28449672, %v1389_v50  ;;  %v1383_v34 = vmul.f32 %v1367_v35, %v3060_v11  ;;  %v1342_v58 = vadd.f32 -1.4531521, %v1326_v44  ;;  %v1480_v2 = vmul.f32 %v1464_v47, %v3038_v20 }
 0x289   :  { %v1622_v27 = vmul.f32 %v1606_v19, %v3042_v22  ;;  %v1412_v60 = vadd.f32 -0.28449672, %v1396_v63  ;;  %v1320_v1 = vmul.f32 1.0614054, %v3097_v51  ;;  %v1225_v25 = vmul.f32 0.3275911, %v3100_v18 }
 0x28a   :  { %v1421_v21 = vmul.f32 %v1405_v40, %v3045_v56  ;;  %v1399_v54 = vadd.f32 -0.28449672, %v1383_v34  ;;  %v1358_v33 = vmul.f32 %v1342_v58, %v3082_v49  ;;  %1864 = vpow2.f32 %v1511_v28 }
 0x28b   :  { %1638 = vst [vmem:[#allocation5 + $0x8] sm:$0xff] %v1622_v27  ;;  %v1428_v32 = vmul.f32 %v1412_v60, %v3047_v30  ;;  %v1336_v20 = vadd.f32 -1.4531521, %v1320_v1  ;;  %v1241_v14 = vadd.f32 1.0, %v1225_v25  ;;  %v1863_v46 = vpop.eup %1862  ;;  %v1499_v26 = vmul.f32 1.442695, %v1480_v2 }
 0x28c   :  { %v1437_v22 = vadd.f32 0.2548296, %v1421_v21  ;;  %v1415_v57 = vmul.f32 %v1399_v54, %v3060_v11  ;;  %v1374_v3 = vadd.f32 1.4214138, %v1358_v33  ;;  %v3113_v19 = vadd.f32 %v1158_v13, %v1103_v42 }
 0x28d   :  { %v1444_v8 = vadd.f32 0.2548296, %v1428_v32  ;;  %v1352_v39 = vmul.f32 %v1336_v20, %v3097_v51  ;;  %v1279_v9 = vmul.f32 %v1863_v46, %v1247_v24  ;;  %v1471_v37 = vsub.f32 0.0, %v3073_v10  ;;  %v1104_v20 = vld [vmem:[#allocation2 + $0x60] sm:$0xff] }
 0x28e   :  { %v1453_v48 = vmul.f32 %v1437_v22, %v3045_v56  ;;  %v1431_v0 = vadd.f32 0.2548296, %v1415_v57  ;;  %v1390_v12 = vmul.f32 %v1374_v3, %v3082_v49  ;;  %1866 = vrcp.f32 %v1241_v14 }
 0x28f   :  { %v1460_v52 = vmul.f32 %v1444_v8, %v3047_v30  ;;  %v1368_v44 = vadd.f32 1.4214138, %v1352_v39  ;;  %v1295_v15 = vsub.f32 2.0, %v1279_v9  ;;  %1868 = vpow2.f32 %v1499_v26 }
 0x290   :  { %v1533_v43 = vmul.f32 %v1855_v55, %v1453_v48  ;;  %v1447_v50 = vmul.f32 %v1431_v0, %v3060_v11  ;;  %v1406_v55 = vadd.f32 -0.28449672, %v1390_v12  ;;  %v1865_v21 = vpop.eup %1864  ;;  %v3121_v47 = vmul.f32 0.70710677, %v3113_v19  ;;  %v1097_v48 = vld [vmem:[#allocation2 + $0x28] sm:$0xff] }
 0x291   :  { %v1540_v56 = vmul.f32 %v1861_v17, %v1460_v52  ;;  %v1384_v58 = vmul.f32 %v1368_v44, %v3097_v51  ;;  %v3126_v54 = vmul.f32 %v1863_v46, %v1295_v15  ;;  %v1487_v17 = vmul.f32 %v1471_v37, %v3073_v10  ;;  %v1161_v46 = vpop.f32.mrf.mxu2 }
 0x292   :  { %v1549_v30 = vsub.f32 1.0, %v1533_v43  ;;  %v1527_v35 = vmul.f32 %v1859_v45, %v1447_v50  ;;  %v1422_v60 = vmul.f32 %v1406_v55, %v3082_v49  ;;  %v3129_v28 = vand.u32 2147483647, %v3121_v47 }
 0x293   :  { %v1556_v63 = vsub.f32 1.0, %v1540_v56  ;;  %v1400_v33 = vadd.f32 -0.28449672, %v1384_v58  ;;  %v1327_v52 = vmul.f32 1.0614054, %v3126_v54  ;;  %v3139_v0 = vadd.f32 %v1140_v41, %v1097_v48 }
 0x294   :  { %v1581_v40 = vsub.f32 0.0, %v1549_v30  ;;  %v1543_v34 = vsub.f32 1.0, %v1527_v35  ;;  %v1438_v32 = vadd.f32 0.2548296, %v1422_v60  ;;  %v1867_v57 = vpop.eup %1866  ;;  %v1232_v3 = vmul.f32 0.3275911, %v3129_v28 }
 0x295   :  { %v1588_v27 = vsub.f32 0.0, %v1556_v63  ;;  %v1869_v13 = vpop.eup %1868  ;;  %v1343_v10 = vadd.f32 -1.4531521, %v1327_v52  ;;  %v1513_v50 = vmul.f32 1.442695, %v1487_v17  ;;  %v1465_v39 = vsub.f32 0.0, %v3100_v18 }
 0x296   :  { %v1597_v11 = vsel %vm1565_vm8, %v1549_v30, %v1581_v40  ;;  %v1575_v22 = vsub.f32 0.0, %v1543_v34  ;;  %v1454_v8 = vmul.f32 %v1438_v32, %v3082_v49  ;;  %v1273_v49 = vmul.f32 %v1867_v57, %v1241_v14 }
 0x297   :  { %v1613_v24 = vadd.f32 1.0, %v1597_v11  ;;  %v1604_v45 = vsel %vm1572_vm9, %v1556_v63, %v1588_v27  ;;  %v1248_v43 = vadd.f32 1.0, %v1232_v3  ;;  %v1359_v30 = vmul.f32 %v1343_v10, %v3126_v54 }
 0x298   :  { %v1620_v4 = vadd.f32 1.0, %v1604_v45  ;;  %v1591_v42 = vsel %vm1559_vm10, %v1543_v34, %v1575_v22  ;;  %v1534_v25 = vmul.f32 %v1865_v21, %v1454_v8  ;;  %v1289_v12 = vsub.f32 2.0, %v1273_v49  ;;  %v1143_v8 = vpop.f32.mrf.mxu1 }
 0x299   :  { %v1629_v7 = vmul.f32 %v1613_v24, %v3058_v6  ;;  %v1607_v1 = vadd.f32 1.0, %v1591_v42  ;;  %v1416_v6 = vmul.f32 %v1400_v33, %v3097_v51  ;;  %1870 = vrcp.f32 %v1248_v43 }
 0x29a   :  { %v1636_v2 = vmul.f32 %v1620_v4, %v1188_v23  ;;  %v1550_v29 = vsub.f32 1.0, %v1534_v25  ;;  %v3144_v63 = vmul.f32 %v1867_v57, %v1289_v12  ;;  %v3147_v55 = vmul.f32 0.70710677, %v3139_v0  ;;  %v1164_v25 = vpop.f32.mrf.mxu2 }
 0x29b   :  { %1645 = vst [vmem:[#allocation5 + $0x40] sm:$0xff] %v1629_v7  ;;  %v1623_v23 = vmul.f32 %v1607_v1, %v3063_v16  ;;  %v1432_v56 = vadd.f32 0.2548296, %v1416_v6  ;;  %v1375_v16 = vadd.f32 1.4214138, %v1359_v30  ;;  %v3151_v9 = vadd.f32 %v1161_v46, %v1104_v20  ;;  %v1098_v7 = vld [vmem:[#allocation2 + $0x30] sm:$0xff] }
 0x29c   :  { %1652 = vst [vmem:[#allocation5 + $0x78] sm:$0xff] %v1636_v2  ;;  %v1582_v26 = vsub.f32 0.0, %v1550_v29  ;;  %v1321_v37 = vmul.f32 1.0614054, %v3144_v63  ;;  %v3155_v27 = vand.u32 2147483647, %v3147_v55  ;;  %1872 = vpow2.f32 %v1513_v50 }
 0x29d   :  { %1639 = vst [vmem:[#allocation5 + $0x10] sm:$0xff] %v1623_v23  ;;  %v1448_v14 = vmul.f32 %v1432_v56, %v3097_v51  ;;  %v1182_v51 = vmul.f32 0.5, %v3020_v59  ;;  %v1391_v44 = vmul.f32 %v1375_v16, %v3126_v54  ;;  %v1481_v45 = vmul.f32 %v1465_v39, %v3100_v18  ;;  %v1105_v1 = vld [vmem:[#allocation2 + $0x68] sm:$0xff] }
 0x29e   :  { %v1598_v40 = vsel %vm1566_vm11, %v1550_v29, %v1582_v26  ;;  %v1337_v53 = vadd.f32 -1.4531521, %v1321_v37  ;;  %v1226_v21 = vmul.f32 0.3275911, %v3155_v27  ;;  %v3162_v32 = vmul.f32 0.70710677, %v3151_v9 }
 0x29f   :  { %v1528_v35 = vmul.f32 %v1869_v13, %v1448_v14  ;;  %v1614_v60 = vadd.f32 1.0, %v1598_v40  ;;  %v1871_v11 = vpop.eup %1870  ;;  %v1407_v24 = vadd.f32 -0.28449672, %v1391_v44  ;;  %v1176_v33 = vmul.f32 0.5, %v3027_v62 }
 0x2a0   :  { %v1353_v4 = vmul.f32 %v1337_v53, %v3144_v63  ;;  %v1280_v59 = vmul.f32 %v1871_v11, %v1248_v43  ;;  %v1242_v22 = vadd.f32 1.0, %v1226_v21  ;;  %v3169_v48 = vand.u32 2147483647, %v3162_v32 }
 0x2a1   :  { %v1544_v15 = vsub.f32 1.0, %v1528_v35  ;;  %v1630_v34 = vmul.f32 %v1614_v60, %v1182_v51  ;;  %v1423_v17 = vmul.f32 %v1407_v24, %v3126_v54  ;;  %v1501_v52 = vmul.f32 1.442695, %v1481_v45 }
 0x2a2   :  { %v1369_v41 = vadd.f32 1.4214138, %v1353_v4  ;;  %v1296_v57 = vsub.f32 2.0, %v1280_v59  ;;  %1874 = vrcp.f32 %v1242_v22  ;;  %v3171_v3 = vadd.f32 %v1143_v8, %v1098_v7  ;;  %v1873_v6 = vpop.eup %1872 }
 0x2a3   :  { %v1576_v58 = vsub.f32 0.0, %v1544_v15  ;;  %1646 = vst [vmem:[#allocation5 + $0x48] sm:$0xff] %v1630_v34  ;;  %v1439_v42 = vadd.f32 0.2548296, %v1423_v17  ;;  %v1472_v49 = vsub.f32 0.0, %v3129_v28  ;;  %v3180_v12 = vadd.f32 %v1164_v25, %v1105_v1 }
 0x2a4   :  { %v1385_v62 = vmul.f32 %v1369_v41, %v3144_v63  ;;  %v3174_v36 = vmul.f32 %v1871_v11, %v1296_v57  ;;  %v1233_v13 = vmul.f32 0.3275911, %v3169_v48  ;;  %1876 = vpow2.f32 %v1501_v52 }
 0x2a5   :  { %v1592_v18 = vsel %vm1560_vm12, %v1544_v15, %v1576_v58  ;;  %v1455_v43 = vmul.f32 %v1439_v42, %v3126_v54  ;;  %v3183_v46 = vmul.f32 0.70710677, %v3171_v3  ;;  %v1488_v14 = vmul.f32 %v1472_v49, %v3129_v28 }
 0x2a6   :  { %v1608_v2 = vadd.f32 1.0, %v1592_v18  ;;  %v1401_v23 = vadd.f32 -0.28449672, %v1385_v62  ;;  %v1328_v29 = vmul.f32 1.0614054, %v3174_v36  ;;  %v1249_v56 = vadd.f32 1.0, %v1233_v13 }
 0x2a7   :  { %v1535_v20 = vmul.f32 %v1873_v6, %v1455_v43  ;;  %v3188_v39 = vand.u32 2147483647, %v3183_v46  ;;  %v1183_v40 = vmul.f32 0.5, %v3055_v61  ;;  %v3193_v51 = vmul.f32 0.70710677, %v3180_v12 }
 0x2a8   :  { %v1624_v10 = vmul.f32 %v1608_v2, %v1176_v33  ;;  %v1875_v30 = vpop.eup %1874  ;;  %v1417_v50 = vmul.f32 %v1401_v23, %v3144_v63  ;;  %v1344_v26 = vadd.f32 -1.4531521, %v1328_v29  ;;  %1878 = vrcp.f32 %v1249_v56 }
 0x2a9   :  { %v1551_v54 = vsub.f32 1.0, %v1535_v20  ;;  %v1274_v16 = vmul.f32 %v1875_v30, %v1242_v22  ;;  %vm1567_vm13 = vcmp.ge.f32.partialorder %v3069_v5, 0.0  ;;  %v1227_v28 = vmul.f32 0.3275911, %v3188_v39 }
 0x2aa   :  { %1640 = vst [vmem:[#allocation5 + $0x18] sm:$0xff] %v1624_v10  ;;  %v1433_v35 = vadd.f32 0.2548296, %v1417_v50  ;;  %v1360_v37 = vmul.f32 %v1344_v26, %v3174_v36  ;;  %v1515_v21 = vmul.f32 1.442695, %v1488_v14  ;;  %v1877_v61 = vpop.eup %1876  ;;  %v1466_v45 = vsub.f32 0.0, %v3155_v27 }
 0x2ab   :  { %v1583_v60 = vsub.f32 0.0, %v1551_v54  ;;  %v1290_v44 = vsub.f32 2.0, %v1274_v16  ;;  %v3199_v11 = vand.u32 2147483647, %v3193_v51  ;;  %v1243_v58 = vadd.f32 1.0, %v1227_v28 }
 0x2ac   :  { %v1449_v15 = vmul.f32 %v1433_v35, %v3144_v63  ;;  %v1376_v53 = vadd.f32 1.4214138, %v1360_v37  ;;  %v1482_v1 = vmul.f32 %v1466_v45, %v3155_v27  ;;  %vm1561_vm14 = vcmp.ge.f32.partialorder %v3093_v31, 0.0 }
 0x2ad   :  { %v1599_v34 = vsel %vm1567_vm13, %v1551_v54, %v1583_v60  ;;  %v3201_v24 = vmul.f32 %v1875_v30, %v1290_v44  ;;  %v1234_v7 = vmul.f32 0.3275911, %v3199_v11  ;;  %1880 = vrcp.f32 %v1243_v58 }
 0x2ae   :  { %v1879_v4 = vpop.eup %1878  ;;  %v1615_v5 = vadd.f32 1.0, %v1599_v34  ;;  %v1529_v59 = vmul.f32 %v1877_v61, %v1449_v15  ;;  %v1392_v22 = vmul.f32 %v1376_v53, %v3174_v36  ;;  %1882 = vpow2.f32 %v1515_v21 }
 0x2af   :  { %v1322_v63 = vmul.f32 1.0614054, %v3201_v24  ;;  %v1281_v8 = vmul.f32 %v1879_v4, %v1249_v56  ;;  %v1250_v41 = vadd.f32 1.0, %v1234_v7  ;;  %v1473_v13 = vsub.f32 0.0, %v3169_v48 }
 0x2b0   :  { %v1631_v33 = vmul.f32 %v1615_v5, %v1183_v40  ;;  %v1545_v17 = vsub.f32 1.0, %v1529_v59  ;;  %v1408_v18 = vadd.f32 -0.28449672, %v1392_v22  ;;  %v1177_v43 = vmul.f32 0.5, %v3079_v38 }
 0x2b1   :  { %v1338_v57 = vadd.f32 -1.4531521, %v1322_v63  ;;  %v1297_v2 = vsub.f32 2.0, %v1281_v8  ;;  %1884 = vrcp.f32 %v1250_v41  ;;  %v1503_v20 = vmul.f32 1.442695, %v1482_v1 }
 0x2b2   :  { %1647 = vst [vmem:[#allocation5 + $0x50] sm:$0xff] %v1631_v33  ;;  %v1577_v42 = vsub.f32 0.0, %v1545_v17  ;;  %v1424_v52 = vmul.f32 %v1408_v18, %v3174_v36  ;;  %v1489_v40 = vmul.f32 %v1473_v13, %v3169_v48  ;;  %v1467_v28 = vsub.f32 0.0, %v3188_v39 }
 0x2b3   :  { %v1354_v25 = vmul.f32 %v1338_v57, %v3201_v24  ;;  %v3211_v6 = vmul.f32 %v1879_v4, %v1297_v2  ;;  %v1881_v10 = vpop.eup %1880  ;;  %1886 = vpow2.f32 %v1503_v20  ;;  %v1184_v61 = vmul.f32 0.5, %v3113_v19 }
 0x2b4   :  { %v1593_v62 = vsel %vm1561_vm14, %v1545_v17, %v1577_v42  ;;  %v1440_v49 = vadd.f32 0.2548296, %v1424_v52  ;;  %v1275_v30 = vmul.f32 %v1881_v10, %v1243_v58  ;;  %v1883_v31 = vpop.eup %1882  ;;  %v1517_v45 = vmul.f32 1.442695, %v1489_v40 }
 0x2b5   :  { %v1609_v23 = vadd.f32 1.0, %v1593_v62  ;;  %v1370_v29 = vadd.f32 1.4214138, %v1354_v25  ;;  %v1329_v56 = vmul.f32 1.0614054, %v3211_v6  ;;  %vm1568_vm15 = vcmp.ge.f32.partialorder %v3121_v47, 0.0 }
 0x2b6   :  { %v1456_v27 = vmul.f32 %v1440_v49, %v3174_v36  ;;  %v1291_v35 = vsub.f32 2.0, %v1275_v30  ;;  %v1483_v7 = vmul.f32 %v1467_v28, %v3188_v39  ;;  %v1474_v63 = vsub.f32 0.0, %v3199_v11 }
 0x2b7   :  { %v1625_v50 = vmul.f32 %v1609_v23, %v1177_v43  ;;  %v1386_v26 = vmul.f32 %v1370_v29, %v3201_v24  ;;  %v1345_v14 = vadd.f32 -1.4531521, %v1329_v56  ;;  %v1885_v54 = vpop.eup %1884  ;;  %1888 = vpow2.f32 %v1517_v45 }
 0x2b8   :  { %v1536_v16 = vmul.f32 %v1883_v31, %v1456_v27  ;;  %v1282_v60 = vmul.f32 %v1885_v54, %v1250_v41  ;;  %v1307_v36 = vmul.f32 %v1881_v10, %v1291_v35  ;;  %v1490_v1 = vmul.f32 %v1474_v63, %v3199_v11 }
 0x2b9   :  { %1641 = vst [vmem:[#allocation5 + $0x20] sm:$0xff] %v1625_v50  ;;  %v1402_v38 = vadd.f32 -0.28449672, %v1386_v26  ;;  %v1361_v37 = vmul.f32 %v1345_v14, %v3211_v6  ;;  %v1887_v18 = vpop.eup %1886  ;;  %v1505_v62 = vmul.f32 1.442695, %v1483_v7  ;;  %vm1562_vm1 = vcmp.ge.f32.partialorder %v3147_v55, 0.0 }
 0x2ba   :  { %v1552_v44 = vsub.f32 1.0, %v1536_v16  ;;  %v1298_v21 = vsub.f32 2.0, %v1282_v60  ;;  %v1323_v48 = vmul.f32 1.0614054, %v1307_v36  ;;  %v1519_v56 = vmul.f32 1.442695, %v1490_v1 }
 0x2bb   :  { %v1418_v15 = vmul.f32 %v1402_v38, %v3201_v24  ;;  %v1377_v53 = vadd.f32 1.4214138, %v1361_v37  ;;  %1890 = vpow2.f32 %v1505_v62  ;;  %v1178_v11 = vmul.f32 0.5, %v3139_v0 }
 0x2bc   :  { %v1584_v34 = vsub.f32 0.0, %v1552_v44  ;;  %v1314_v5 = vmul.f32 %v1885_v54, %v1298_v21  ;;  %v1339_v22 = vadd.f32 -1.4531521, %v1323_v48  ;;  %1892 = vpow2.f32 %v1519_v56 }
 0x2bd   :  { %v1434_v58 = vadd.f32 0.2548296, %v1418_v15  ;;  %v1393_v4 = vmul.f32 %v1377_v53, %v3211_v6  ;;  %v1889_v23 = vpop.eup %1888  ;;  %vm1569_vm2 = vcmp.ge.f32.partialorder %v3162_v32, 0.0  ;;  %v1185_v60 = vmul.f32 0.5, %v3151_v9 }
 0x2be   :  { %v1600_v59 = vsel %vm1568_vm15, %v1552_v44, %v1584_v34  ;;  %v1330_v19 = vmul.f32 1.0614054, %v1314_v5  ;;  %v1355_v41 = vmul.f32 %v1339_v22, %v1307_v36  ;;  %vm1563_vm3 = vcmp.ge.f32.partialorder %v3183_v46, 0.0 }
 0x2bf   :  { %v1616_v8 = vadd.f32 1.0, %v1600_v59  ;;  %v1450_v33 = vmul.f32 %v1434_v58, %v3201_v24  ;;  %v1409_v17 = vadd.f32 -0.28449672, %v1393_v4  ;;  %v1179_v32 = vmul.f32 0.5, %v3171_v3 }
 0x2c0   :  { %v1346_v42 = vadd.f32 -1.4531521, %v1330_v19  ;;  %v1371_v52 = vadd.f32 1.4214138, %v1355_v41  ;;  %vm1570_vm4 = vcmp.ge.f32.partialorder %v3193_v51, 0.0 }
 0x2c1   :  { %v1632_v57 = vmul.f32 %v1616_v8, %v1184_v61  ;;  %v1530_v47 = vmul.f32 %v1887_v18, %v1450_v33  ;;  %v1425_v2 = vmul.f32 %v1409_v17, %v3211_v6  ;;  %v1891_v35 = vpop.eup %1890 }
 0x2c2   :  { %v1362_v49 = vmul.f32 %v1346_v42, %v1314_v5  ;;  %v1387_v13 = vmul.f32 %v1371_v52, %v1307_v36  ;;  %v1893_v15 = vpop.eup %1892 }
 0x2c3   :  { %1648 = vst [vmem:[#allocation5 + $0x58] sm:$0xff] %v1632_v57  ;;  %v1546_v39 = vsub.f32 1.0, %v1530_v47  ;;  %v1441_v25 = vadd.f32 0.2548296, %v1425_v2 }
 0x2c4   :  { %v1378_v43 = vadd.f32 1.4214138, %v1362_v49  ;;  %v1403_v29 = vadd.f32 -0.28449672, %v1387_v13 }
 0x2c5   :  { %v1578_v24 = vsub.f32 0.0, %v1546_v39  ;;  %v1457_v10 = vmul.f32 %v1441_v25, %v3211_v6 }
 0x2c6   :  { %v1394_v30 = vmul.f32 %v1378_v43, %v1314_v5  ;;  %v1419_v50 = vmul.f32 %v1403_v29, %v1307_v36 }
 0x2c7   :  { %v1594_v27 = vsel %vm1562_vm1, %v1546_v39, %v1578_v24  ;;  %v1537_v20 = vmul.f32 %v1889_v23, %v1457_v10 }
 0x2c8   :  { %v1610_v31 = vadd.f32 1.0, %v1594_v27  ;;  %v1410_v14 = vadd.f32 -0.28449672, %v1394_v30  ;;  %v1435_v16 = vadd.f32 0.2548296, %v1419_v50 }
 0x2c9   :  { %v1553_v26 = vsub.f32 1.0, %v1537_v20 }
 0x2ca   :  { %v1626_v54 = vmul.f32 %v1610_v31, %v1178_v11  ;;  %v1426_v40 = vmul.f32 %v1410_v14, %v1314_v5  ;;  %v1451_v55 = vmul.f32 %v1435_v16, %v1307_v36 }
 0x2cb   :  { %v1585_v6 = vsub.f32 0.0, %v1553_v26 }
 0x2cc   :  { %1642 = vst [vmem:[#allocation5 + $0x28] sm:$0xff] %v1626_v54  ;;  %v1442_v37 = vadd.f32 0.2548296, %v1426_v40  ;;  %v1531_v0 = vmul.f32 %v1891_v35, %v1451_v55 }
 0x2cd   :  { %v1601_v38 = vsel %vm1569_vm2, %v1553_v26, %v1585_v6 }
 0x2ce   :  { %v1617_v44 = vadd.f32 1.0, %v1601_v38  ;;  %v1458_v28 = vmul.f32 %v1442_v37, %v1314_v5  ;;  %v1547_v21 = vsub.f32 1.0, %v1531_v0  ;;  %v1186_v5 = vmul.f32 0.5, %v3180_v12 }
 0x2d0   :  { %v1633_v53 = vmul.f32 %v1617_v44, %v1185_v60  ;;  %v1538_v61 = vmul.f32 %v1893_v15, %v1458_v28  ;;  %v1579_v34 = vsub.f32 0.0, %v1547_v21 }
 0x2d2   :  { %1649 = vst [vmem:[#allocation5 + $0x60] sm:$0xff] %v1633_v53  ;;  %v1554_v45 = vsub.f32 1.0, %v1538_v61  ;;  %v1595_v48 = vsel %vm1563_vm3, %v1547_v21, %v1579_v34 }
 0x2d3   :  { %v1611_v36 = vadd.f32 1.0, %v1595_v48 }
 0x2d4   :  { %v1586_v58 = vsub.f32 0.0, %v1554_v45 }
 0x2d5   :  { %v1627_v9 = vmul.f32 %v1611_v36, %v1179_v32 }
 0x2d6   :  { %v1602_v4 = vsel %vm1570_vm4, %v1554_v45, %v1586_v58 }
 0x2d7   :  { %v1618_v59 = vadd.f32 1.0, %v1602_v4  ;;  %1643 = vst [vmem:[#allocation5 + $0x30] sm:$0xff] %v1627_v9 }
 0x2d9   :  { %v1634_v46 = vmul.f32 %v1618_v59, %v1186_v5 }
 0x2db   :  { %1650 = vst [vmem:[#allocation5 + $0x68] sm:$0xff] %v1634_v46 }
 0x2dc   :  { %1665 = dma.vmem_to_hbm [thread:$0]  %s1658_s10, 2048, %s1660_s12, [#allocation4], %s1947_s29, %s1947_s29, %s1948_s30  }
 0x2dd   :  { %1944 = dma.done.wait [#allocation4], 2048  }
 0x2de   :  { %1945 = vsyncadd [#allocation4], 4294965248 }
 0x2df   :  { %1670 = vsyncpa [#allocation3], 1 }
 0x2e0   :  { %1671 = vsyncpa [#allocation4], 1 }

</bundles_post_ra>
